<compile_context>
chip_gen: v7x
topology: tpu7x:2x2x1
jax: 0.10.0
libtpu: 0.0.40
codegen_flags: <defaults>
</compile_context>

<pallas_src>
import jax
import jax.numpy as jnp
from jax.experimental import pallas as pl
from jax.experimental.pallas import tpu as pltpu

HIDDEN = 512


def _round_up(x, m):
    return ((x + m - 1) // m) * m


def _cdiv(a, b):
    return (a + b - 1) // b


def _choose_tile(B, tb):
    """Pick the batch tile size TB.

    * B <= 256      : a single tile rounded to the 8-row sublane quantum.
    * 256 < B <= 2tb: two balanced 256-aligned tiles (so v7x's two TCs both get work).
    * larger        : the (256-aligned) user tile, default 1024.
    """
    tb = max(256, _round_up(tb, 256))
    if B <= 256:
        return _round_up(max(B, 8), 8)
    if B <= 2 * tb:
        return _round_up(_cdiv(B, 2), 256)
    return tb


def radio_mlp_kernel(x_ref, w1_ref, b1_ref, w2_ref, b2_ref,
                     w3_ref, b3_ref, w4_ref, b4_ref, o_ref):
    bf16, f32 = jnp.bfloat16, jnp.float32

    # fc1 + relu  (bf16 MXU operands, f32 accumulation, bf16 inter-layer temp)
    h = jnp.dot(x_ref[...].astype(bf16), w1_ref[...], preferred_element_type=f32)
    h = jnp.maximum(h + b1_ref[...], 0.0).astype(bf16)
    # fc2 + relu
    h = jnp.dot(h, w2_ref[...], preferred_element_type=f32)
    h = jnp.maximum(h + b2_ref[...], 0.0).astype(bf16)
    # fc3 + relu (kept f32 feeding the head)
    h = jnp.dot(h, w3_ref[...], preferred_element_type=f32)
    h = jnp.maximum(h + b3_ref[...], 0.0)
    # fc4 (512 -> 1): VPU multiply + cross-lane reduction, lane-dense (1, TB) store.
    out_vec = jnp.sum(h * w4_ref[...], axis=-1)                    # (TB,)
    o_ref[...] = (out_vec[None, :] + b4_ref[...]).astype(o_ref.dtype)


def _make_call(D, TB, n_tiles, arrays, single_buffer_weights):
    B_out = n_tiles * TB
    w1, b1, w2, b2, w3, b3, w4, b4 = arrays

    def resident(a):
        # Block index never changes across the grid: the array stays VMEM-resident.
        if single_buffer_weights:
            return pl.BlockSpec(a.shape, lambda i: (0, 0),
                                pipeline_mode=pl.Buffered(1))
        return pl.BlockSpec(a.shape, lambda i: (0, 0))

    return pl.pallas_call(
        radio_mlp_kernel,
        out_shape=jax.ShapeDtypeStruct((1, B_out), jnp.float32),
        grid=(n_tiles,),
        in_specs=[
            pl.BlockSpec((TB, D), lambda i: (i, 0)),   # x: streamed batch tiles
            resident(w1), resident(b1),
            resident(w2), resident(b2),
            resident(w3), resident(b3),
            resident(w4), resident(b4),
        ],
        out_specs=pl.BlockSpec((1, TB), lambda i: (0, i)),
        compiler_params=pltpu.CompilerParams(
            dimension_semantics=("parallel",),
            vmem_limit_bytes=32 * 1024 * 1024,
        ),
    )


def radio_model_forward(x, params, *, tb=1024):
    """x: [B, D] float32. Returns [B, 1] float32."""
    B, D = x.shape
    TB = _choose_tile(B, tb)
    n_tiles = _cdiv(B, TB)
    B_out = n_tiles * TB   # output covers the whole tile grid; tail rows sliced off below

    arrays = (params["w1"], params["b1"], params["w2"], params["b2"],
              params["w3"], params["b3"], params["w4"], params["b4"])

    try:
        out = _make_call(D, TB, n_tiles, arrays, single_buffer_weights=True)(x, *arrays)
    except Exception:
        # Fallback if this jax build rejects pipeline_mode=pl.Buffered(1).
        out = _make_call(D, TB, n_tiles, arrays, single_buffer_weights=False)(x, *arrays)

    return out.reshape(B_out, 1)[:B]


def init_params(key, input_dim):
    """Mimics nn.Linear's U(-1/sqrt(fan_in), 1/sqrt(fan_in)) init.

    fc1..fc3 weights are stored [in, out] in bf16; fc4 is stored as a float32
    row vector [1, 512] (it feeds a VPU reduction, not the MXU). Biases are f32.
    """
    dims = [(input_dim, HIDDEN), (HIDDEN, HIDDEN), (HIDDEN, HIDDEN), (HIDDEN, 1)]
    params = {}
    keys = jax.random.split(key, 2 * len(dims))
    for i, (fan_in, fan_out) in enumerate(dims):
        bound = float(fan_in) ** -0.5
        w = jax.random.uniform(keys[2 * i], (fan_in, fan_out), jnp.float32,
                               minval=-bound, maxval=bound)
        b = jax.random.uniform(keys[2 * i + 1], (1, fan_out), jnp.float32,
                               minval=-bound, maxval=bound)
        if i < 3:
            params[f"w{i + 1}"] = w.astype(jnp.bfloat16)
        else:
            params[f"w{i + 1}"] = w.T          # (1, 512) float32 row vector
        params[f"b{i + 1}"] = b
    return params


def reference_forward(x, params):
    """Pure-JAX reference with identical bf16-operand / f32-accumulate numerics."""
    bf16, f32 = jnp.bfloat16, jnp.float32
    h = jnp.dot(x.astype(bf16), params["w1"], preferred_element_type=f32)
    h = jnp.maximum(h + params["b1"], 0.0).astype(bf16)
    h = jnp.dot(h, params["w2"], preferred_element_type=f32)
    h = jnp.maximum(h + params["b2"], 0.0).astype(bf16)
    h = jnp.dot(h, params["w3"], preferred_element_type=f32)
    h = jnp.maximum(h + params["b3"], 0.0)
    return jnp.sum(h * params["w4"], axis=-1, keepdims=True) + params["b4"]


if __name__ == "__main__":
    key = jax.random.PRNGKey(0)
    k_x, k_p, k_x2 = jax.random.split(key, 3)

    # Small shapes consistent with RadioModel(input_dim=32): batch=8, input_dim=32.
    B, D = 8, 32
    x = jax.random.normal(k_x, (B, D), dtype=jnp.float32)
    params = init_params(k_p, D)

    out = jax.block_until_ready(radio_model_forward(x, params))
    ref = reference_forward(x, params)
    assert out.shape == (B, 1)
    assert jnp.allclose(out, ref, atol=3e-3, rtol=3e-3), "Pallas output mismatch vs reference"

    # Multi-tile sanity check: B=600 -> two balanced 512-row tiles, ragged (masked) tail
    # read on the second tile, no wrapper-side padding copy of x.
    B2 = 600
    x2 = jax.random.normal(k_x2, (B2, D), dtype=jnp.float32)
    out2 = jax.block_until_ready(radio_model_forward(x2, params))
    ref2 = reference_forward(x2, params)
    assert out2.shape == (B2, 1)
    assert jnp.allclose(out2, ref2, atol=3e-3, rtol=3e-3), "Pallas output mismatch (tiled)"

    print("KERNEL_OK")
</pallas_src>

<mosaic_0001>
module attributes {stable_mosaic.version = 11 : i64} {
  func.func @radio_mlp_kernel(%arg0: i32, %arg1: memref<8x32xf32, #tpu.memory_space<vmem>>, %arg2: memref<32x512xbf16, #tpu.memory_space<vmem>>, %arg3: memref<1x512xf32, #tpu.memory_space<vmem>>, %arg4: memref<512x512xbf16, #tpu.memory_space<vmem>>, %arg5: memref<1x512xf32, #tpu.memory_space<vmem>>, %arg6: memref<512x512xbf16, #tpu.memory_space<vmem>>, %arg7: memref<1x512xf32, #tpu.memory_space<vmem>>, %arg8: memref<1x512xf32, #tpu.memory_space<vmem>>, %arg9: memref<1x1xf32, #tpu.memory_space<vmem>>, %arg10: memref<1x8xf32, #tpu.memory_space<vmem>>) attributes {dimension_semantics = [#tpu.dimension_semantics<parallel>], iteration_bounds = array<i64: 1>, scalar_prefetch = 0 : i64, scratch_operands = 0 : i64, tpu.core_type = #tpu.core_type<tc>, window_params = [{transform_indices = @transform_0, window_bounds = array<i64: 8, 32>}, {pipeline_mode = #tpu.pipeline_mode<synchronous>, transform_indices = @transform_1, window_bounds = array<i64: 32, 512>}, {pipeline_mode = #tpu.pipeline_mode<synchronous>, transform_indices = @transform_2, window_bounds = array<i64: 1, 512>}, {pipeline_mode = #tpu.pipeline_mode<synchronous>, transform_indices = @transform_3, window_bounds = array<i64: 512, 512>}, {pipeline_mode = #tpu.pipeline_mode<synchronous>, transform_indices = @transform_4, window_bounds = array<i64: 1, 512>}, {pipeline_mode = #tpu.pipeline_mode<synchronous>, transform_indices = @transform_5, window_bounds = array<i64: 512, 512>}, {pipeline_mode = #tpu.pipeline_mode<synchronous>, transform_indices = @transform_6, window_bounds = array<i64: 1, 512>}, {pipeline_mode = #tpu.pipeline_mode<synchronous>, transform_indices = @transform_7, window_bounds = array<i64: 1, 512>}, {pipeline_mode = #tpu.pipeline_mode<synchronous>, transform_indices = @transform_8, window_bounds = array<i64: 1, 1>}, {transform_indices = @transform_9, window_bounds = array<i64: 1, 8>}]} {
    %c0 = arith.constant 0 : index
    %c0_0 = arith.constant 0 : index
    %0 = vector.load %arg1[%c0, %c0_0] : memref<8x32xf32, #tpu.memory_space<vmem>>, vector<8x32xf32>
    %1 = arith.truncf %0 : vector<8x32xf32> to vector<8x32xbf16>
    %c0_1 = arith.constant 0 : index
    %c0_2 = arith.constant 0 : index
    %2 = vector.load %arg2[%c0_1, %c0_2] : memref<32x512xbf16, #tpu.memory_space<vmem>>, vector<32x512xbf16>
    %cst = arith.constant dense<0.000000e+00> : vector<8x512xf32>
    %3 = tpu.matmul %1, %2, %cst {dimension_numbers = #tpu.dot_dimension_numbers<[1], [0], [0], [1], [0, 0, 1, 1], [], []>} : vector<8x32xbf16>, vector<32x512xbf16>, vector<8x512xf32> -> vector<8x512xf32>
    %c0_3 = arith.constant 0 : index
    %c0_4 = arith.constant 0 : index
    %4 = vector.load %arg3[%c0_3, %c0_4] : memref<1x512xf32, #tpu.memory_space<vmem>>, vector<1x512xf32>
    %5 = vector.broadcast %4 : vector<1x512xf32> to vector<8x512xf32>
    %6 = arith.addf %3, %5 : vector<8x512xf32>
    %cst_5 = arith.constant 0.000000e+00 : f32
    %7 = vector.broadcast %cst_5 : f32 to vector<8x512xf32>
    %8 = arith.maximumf %6, %7 : vector<8x512xf32>
    %9 = arith.truncf %8 : vector<8x512xf32> to vector<8x512xbf16>
    %c0_6 = arith.constant 0 : index
    %c0_7 = arith.constant 0 : index
    %10 = vector.load %arg4[%c0_6, %c0_7] : memref<512x512xbf16, #tpu.memory_space<vmem>>, vector<512x512xbf16>
    %cst_8 = arith.constant dense<0.000000e+00> : vector<8x512xf32>
    %11 = tpu.matmul %9, %10, %cst_8 {dimension_numbers = #tpu.dot_dimension_numbers<[1], [0], [0], [1], [0, 0, 1, 1], [], []>} : vector<8x512xbf16>, vector<512x512xbf16>, vector<8x512xf32> -> vector<8x512xf32>
    %c0_9 = arith.constant 0 : index
    %c0_10 = arith.constant 0 : index
    %12 = vector.load %arg5[%c0_9, %c0_10] : memref<1x512xf32, #tpu.memory_space<vmem>>, vector<1x512xf32>
    %13 = vector.broadcast %12 : vector<1x512xf32> to vector<8x512xf32>
    %14 = arith.addf %11, %13 : vector<8x512xf32>
    %cst_11 = arith.constant 0.000000e+00 : f32
    %15 = vector.broadcast %cst_11 : f32 to vector<8x512xf32>
    %16 = arith.maximumf %14, %15 : vector<8x512xf32>
    %17 = arith.truncf %16 : vector<8x512xf32> to vector<8x512xbf16>
    %c0_12 = arith.constant 0 : index
    %c0_13 = arith.constant 0 : index
    %18 = vector.load %arg6[%c0_12, %c0_13] : memref<512x512xbf16, #tpu.memory_space<vmem>>, vector<512x512xbf16>
    %cst_14 = arith.constant dense<0.000000e+00> : vector<8x512xf32>
    %19 = tpu.matmul %17, %18, %cst_14 {dimension_numbers = #tpu.dot_dimension_numbers<[1], [0], [0], [1], [0, 0, 1, 1], [], []>} : vector<8x512xbf16>, vector<512x512xbf16>, vector<8x512xf32> -> vector<8x512xf32>
    %c0_15 = arith.constant 0 : index
    %c0_16 = arith.constant 0 : index
    %20 = vector.load %arg7[%c0_15, %c0_16] : memref<1x512xf32, #tpu.memory_space<vmem>>, vector<1x512xf32>
    %21 = vector.broadcast %20 : vector<1x512xf32> to vector<8x512xf32>
    %22 = arith.addf %19, %21 : vector<8x512xf32>
    %cst_17 = arith.constant 0.000000e+00 : f32
    %23 = vector.broadcast %cst_17 : f32 to vector<8x512xf32>
    %24 = arith.maximumf %22, %23 : vector<8x512xf32>
    %c0_18 = arith.constant 0 : index
    %c0_19 = arith.constant 0 : index
    %25 = vector.load %arg8[%c0_18, %c0_19] : memref<1x512xf32, #tpu.memory_space<vmem>>, vector<1x512xf32>
    %26 = vector.broadcast %25 : vector<1x512xf32> to vector<8x512xf32>
    %27 = arith.mulf %24, %26 : vector<8x512xf32>
    %cst_20 = arith.constant dense<0.000000e+00> : vector<8xf32>
    %28 = vector.multi_reduction <add>, %27, %cst_20 [1] : vector<8x512xf32> to vector<8xf32>
    %29 = vector.shape_cast %28 : vector<8xf32> to vector<1x8xf32>
    %c0_21 = arith.constant 0 : index
    %c0_22 = arith.constant 0 : index
    %30 = vector.load %arg9[%c0_21, %c0_22] : memref<1x1xf32, #tpu.memory_space<vmem>>, vector<1x1xf32>
    %31 = vector.broadcast %30 : vector<1x1xf32> to vector<1x8xf32>
    %32 = arith.addf %29, %31 : vector<1x8xf32>
    %c0_23 = arith.constant 0 : index
    %c0_24 = arith.constant 0 : index
    %33 = vector.load %arg10[%c0_23, %c0_24] : memref<1x8xf32, #tpu.memory_space<vmem>>, vector<1x8xf32>
    tpu.vector_store %arg10[%c0_23, %c0_24], %32 {strides = array<i32>} : memref<1x8xf32, #tpu.memory_space<vmem>>, vector<1x8xf32>,
    return
  }
  func.func @transform_0(%arg0: i32) -> (i32, i32) {
    %c0_i32 = arith.constant 0 : i32
    %c0_i32_0 = arith.constant 0 : i32
    return %arg0, %c0_i32 : i32, i32
  }
  func.func @transform_1(%arg0: i32) -> (i32, i32) {
    %c0_i32 = arith.constant 0 : i32
    %c0_i32_0 = arith.constant 0 : i32
    %c0_i32_1 = arith.constant 0 : i32
    return %c0_i32, %c0_i32_0 : i32, i32
  }
  func.func @transform_2(%arg0: i32) -> (i32, i32) {
    %c0_i32 = arith.constant 0 : i32
    %c0_i32_0 = arith.constant 0 : i32
    %c0_i32_1 = arith.constant 0 : i32
    return %c0_i32, %c0_i32_0 : i32, i32
  }
  func.func @transform_3(%arg0: i32) -> (i32, i32) {
    %c0_i32 = arith.constant 0 : i32
    %c0_i32_0 = arith.constant 0 : i32
    %c0_i32_1 = arith.constant 0 : i32
    return %c0_i32, %c0_i32_0 : i32, i32
  }
  func.func @transform_4(%arg0: i32) -> (i32, i32) {
    %c0_i32 = arith.constant 0 : i32
    %c0_i32_0 = arith.constant 0 : i32
    %c0_i32_1 = arith.constant 0 : i32
    return %c0_i32, %c0_i32_0 : i32, i32
  }
  func.func @transform_5(%arg0: i32) -> (i32, i32) {
    %c0_i32 = arith.constant 0 : i32
    %c0_i32_0 = arith.constant 0 : i32
    %c0_i32_1 = arith.constant 0 : i32
    return %c0_i32, %c0_i32_0 : i32, i32
  }
  func.func @transform_6(%arg0: i32) -> (i32, i32) {
    %c0_i32 = arith.constant 0 : i32
    %c0_i32_0 = arith.constant 0 : i32
    %c0_i32_1 = arith.constant 0 : i32
    return %c0_i32, %c0_i32_0 : i32, i32
  }
  func.func @transform_7(%arg0: i32) -> (i32, i32) {
    %c0_i32 = arith.constant 0 : i32
    %c0_i32_0 = arith.constant 0 : i32
    %c0_i32_1 = arith.constant 0 : i32
    return %c0_i32, %c0_i32_0 : i32, i32
  }
  func.func @transform_8(%arg0: i32) -> (i32, i32) {
    %c0_i32 = arith.constant 0 : i32
    %c0_i32_0 = arith.constant 0 : i32
    %c0_i32_1 = arith.constant 0 : i32
    return %c0_i32, %c0_i32_0 : i32, i32
  }
  func.func @transform_9(%arg0: i32) -> (i32, i32) {
    %c0_i32 = arith.constant 0 : i32
    %c0_i32_0 = arith.constant 0 : i32
    return %c0_i32, %arg0 : i32, i32
  }
}

module attributes {stable_mosaic.version = 11 : i64} {
  func.func @radio_mlp_kernel(%arg0: i32, %arg1: memref<8x32xf32, #tpu.memory_space<vmem>>, %arg2: memref<32x512xbf16, #tpu.memory_space<vmem>>, %arg3: memref<1x512xf32, #tpu.memory_space<vmem>>, %arg4: memref<512x512xbf16, #tpu.memory_space<vmem>>, %arg5: memref<1x512xf32, #tpu.memory_space<vmem>>, %arg6: memref<512x512xbf16, #tpu.memory_space<vmem>>, %arg7: memref<1x512xf32, #tpu.memory_space<vmem>>, %arg8: memref<1x512xf32, #tpu.memory_space<vmem>>, %arg9: memref<1x1xf32, #tpu.memory_space<vmem>>, %arg10: memref<1x8xf32, #tpu.memory_space<vmem>>) attributes {dimension_semantics = [#tpu.dimension_semantics<parallel>], iteration_bounds = array<i64: 1>, scalar_prefetch = 0 : i64, scratch_operands = 0 : i64, tpu.core_type = #tpu.core_type<tc>, window_params = [{transform_indices = @transform_0, window_bounds = array<i64: 8, 32>}, {pipeline_mode = #tpu.pipeline_mode<synchronous>, transform_indices = @transform_1, window_bounds = array<i64: 32, 512>}, {pipeline_mode = #tpu.pipeline_mode<synchronous>, transform_indices = @transform_2, window_bounds = array<i64: 1, 512>}, {pipeline_mode = #tpu.pipeline_mode<synchronous>, transform_indices = @transform_3, window_bounds = array<i64: 512, 512>}, {pipeline_mode = #tpu.pipeline_mode<synchronous>, transform_indices = @transform_4, window_bounds = array<i64: 1, 512>}, {pipeline_mode = #tpu.pipeline_mode<synchronous>, transform_indices = @transform_5, window_bounds = array<i64: 512, 512>}, {pipeline_mode = #tpu.pipeline_mode<synchronous>, transform_indices = @transform_6, window_bounds = array<i64: 1, 512>}, {pipeline_mode = #tpu.pipeline_mode<synchronous>, transform_indices = @transform_7, window_bounds = array<i64: 1, 512>}, {pipeline_mode = #tpu.pipeline_mode<synchronous>, transform_indices = @transform_8, window_bounds = array<i64: 1, 1>}, {transform_indices = @transform_9, window_bounds = array<i64: 1, 8>}]} {
    %c0 = arith.constant 0 : index
    %c0_0 = arith.constant 0 : index
    %0 = vector.load %arg1[%c0, %c0_0] : memref<8x32xf32, #tpu.memory_space<vmem>>, vector<8x32xf32>
    %1 = arith.truncf %0 : vector<8x32xf32> to vector<8x32xbf16>
    %c0_1 = arith.constant 0 : index
    %c0_2 = arith.constant 0 : index
    %2 = vector.load %arg2[%c0_1, %c0_2] : memref<32x512xbf16, #tpu.memory_space<vmem>>, vector<32x512xbf16>
    %cst = arith.constant dense<0.000000e+00> : vector<8x512xf32>
    %3 = tpu.matmul %1, %2, %cst {dimension_numbers = #tpu.dot_dimension_numbers<[1], [0], [0], [1], [0, 0, 1, 1], [], []>} : vector<8x32xbf16>, vector<32x512xbf16>, vector<8x512xf32> -> vector<8x512xf32>
    %c0_3 = arith.constant 0 : index
    %c0_4 = arith.constant 0 : index
    %4 = vector.load %arg3[%c0_3, %c0_4] : memref<1x512xf32, #tpu.memory_space<vmem>>, vector<1x512xf32>
    %5 = vector.broadcast %4 : vector<1x512xf32> to vector<8x512xf32>
    %6 = arith.addf %3, %5 : vector<8x512xf32>
    %cst_5 = arith.constant 0.000000e+00 : f32
    %7 = vector.broadcast %cst_5 : f32 to vector<8x512xf32>
    %8 = arith.maximumf %6, %7 : vector<8x512xf32>
    %9 = arith.truncf %8 : vector<8x512xf32> to vector<8x512xbf16>
    %c0_6 = arith.constant 0 : index
    %c0_7 = arith.constant 0 : index
    %10 = vector.load %arg4[%c0_6, %c0_7] : memref<512x512xbf16, #tpu.memory_space<vmem>>, vector<512x512xbf16>
    %cst_8 = arith.constant dense<0.000000e+00> : vector<8x512xf32>
    %11 = tpu.matmul %9, %10, %cst_8 {dimension_numbers = #tpu.dot_dimension_numbers<[1], [0], [0], [1], [0, 0, 1, 1], [], []>} : vector<8x512xbf16>, vector<512x512xbf16>, vector<8x512xf32> -> vector<8x512xf32>
    %c0_9 = arith.constant 0 : index
    %c0_10 = arith.constant 0 : index
    %12 = vector.load %arg5[%c0_9, %c0_10] : memref<1x512xf32, #tpu.memory_space<vmem>>, vector<1x512xf32>
    %13 = vector.broadcast %12 : vector<1x512xf32> to vector<8x512xf32>
    %14 = arith.addf %11, %13 : vector<8x512xf32>
    %cst_11 = arith.constant 0.000000e+00 : f32
    %15 = vector.broadcast %cst_11 : f32 to vector<8x512xf32>
    %16 = arith.maximumf %14, %15 : vector<8x512xf32>
    %17 = arith.truncf %16 : vector<8x512xf32> to vector<8x512xbf16>
    %c0_12 = arith.constant 0 : index
    %c0_13 = arith.constant 0 : index
    %18 = vector.load %arg6[%c0_12, %c0_13] : memref<512x512xbf16, #tpu.memory_space<vmem>>, vector<512x512xbf16>
    %cst_14 = arith.constant dense<0.000000e+00> : vector<8x512xf32>
    %19 = tpu.matmul %17, %18, %cst_14 {dimension_numbers = #tpu.dot_dimension_numbers<[1], [0], [0], [1], [0, 0, 1, 1], [], []>} : vector<8x512xbf16>, vector<512x512xbf16>, vector<8x512xf32> -> vector<8x512xf32>
    %c0_15 = arith.constant 0 : index
    %c0_16 = arith.constant 0 : index
    %20 = vector.load %arg7[%c0_15, %c0_16] : memref<1x512xf32, #tpu.memory_space<vmem>>, vector<1x512xf32>
    %21 = vector.broadcast %20 : vector<1x512xf32> to vector<8x512xf32>
    %22 = arith.addf %19, %21 : vector<8x512xf32>
    %cst_17 = arith.constant 0.000000e+00 : f32
    %23 = vector.broadcast %cst_17 : f32 to vector<8x512xf32>
    %24 = arith.maximumf %22, %23 : vector<8x512xf32>
    %c0_18 = arith.constant 0 : index
    %c0_19 = arith.constant 0 : index
    %25 = vector.load %arg8[%c0_18, %c0_19] : memref<1x512xf32, #tpu.memory_space<vmem>>, vector<1x512xf32>
    %26 = vector.broadcast %25 : vector<1x512xf32> to vector<8x512xf32>
    %27 = arith.mulf %24, %26 : vector<8x512xf32>
    %cst_20 = arith.constant dense<0.000000e+00> : vector<8xf32>
    %28 = vector.multi_reduction <add>, %27, %cst_20 [1] : vector<8x512xf32> to vector<8xf32>
    %29 = vector.shape_cast %28 : vector<8xf32> to vector<1x8xf32>
    %c0_21 = arith.constant 0 : index
    %c0_22 = arith.constant 0 : index
    %30 = vector.load %arg9[%c0_21, %c0_22] : memref<1x1xf32, #tpu.memory_space<vmem>>, vector<1x1xf32>
    %31 = vector.broadcast %30 : vector<1x1xf32> to vector<1x8xf32>
    %32 = arith.addf %29, %31 : vector<1x8xf32>
    %c0_23 = arith.constant 0 : index
    %c0_24 = arith.constant 0 : index
    %33 = vector.load %arg10[%c0_23, %c0_24] : memref<1x8xf32, #tpu.memory_space<vmem>>, vector<1x8xf32>
    tpu.vector_store %arg10[%c0_23, %c0_24], %32 {strides = array<i32>} : memref<1x8xf32, #tpu.memory_space<vmem>>, vector<1x8xf32>,
    return
  }
  func.func @transform_0(%arg0: i32) -> (i32, i32) {
    %c0_i32 = arith.constant 0 : i32
    %c0_i32_0 = arith.constant 0 : i32
    return %arg0, %c0_i32 : i32, i32
  }
  func.func @transform_1(%arg0: i32) -> (i32, i32) {
    %c0_i32 = arith.constant 0 : i32
    %c0_i32_0 = arith.constant 0 : i32
    %c0_i32_1 = arith.constant 0 : i32
    return %c0_i32, %c0_i32_0 : i32, i32
  }
  func.func @transform_2(%arg0: i32) -> (i32, i32) {
    %c0_i32 = arith.constant 0 : i32
    %c0_i32_0 = arith.constant 0 : i32
    %c0_i32_1 = arith.constant 0 : i32
    return %c0_i32, %c0_i32_0 : i32, i32
  }
  func.func @transform_3(%arg0: i32) -> (i32, i32) {
    %c0_i32 = arith.constant 0 : i32
    %c0_i32_0 = arith.constant 0 : i32
    %c0_i32_1 = arith.constant 0 : i32
    return %c0_i32, %c0_i32_0 : i32, i32
  }
  func.func @transform_4(%arg0: i32) -> (i32, i32) {
    %c0_i32 = arith.constant 0 : i32
    %c0_i32_0 = arith.constant 0 : i32
    %c0_i32_1 = arith.constant 0 : i32
    return %c0_i32, %c0_i32_0 : i32, i32
  }
  func.func @transform_5(%arg0: i32) -> (i32, i32) {
    %c0_i32 = arith.constant 0 : i32
    %c0_i32_0 = arith.constant 0 : i32
    %c0_i32_1 = arith.constant 0 : i32
    return %c0_i32, %c0_i32_0 : i32, i32
  }
  func.func @transform_6(%arg0: i32) -> (i32, i32) {
    %c0_i32 = arith.constant 0 : i32
    %c0_i32_0 = arith.constant 0 : i32
    %c0_i32_1 = arith.constant 0 : i32
    return %c0_i32, %c0_i32_0 : i32, i32
  }
  func.func @transform_7(%arg0: i32) -> (i32, i32) {
    %c0_i32 = arith.constant 0 : i32
    %c0_i32_0 = arith.constant 0 : i32
    %c0_i32_1 = arith.constant 0 : i32
    return %c0_i32, %c0_i32_0 : i32, i32
  }
  func.func @transform_8(%arg0: i32) -> (i32, i32) {
    %c0_i32 = arith.constant 0 : i32
    %c0_i32_0 = arith.constant 0 : i32
    %c0_i32_1 = arith.constant 0 : i32
    return %c0_i32, %c0_i32_0 : i32, i32
  }
  func.func @transform_9(%arg0: i32) -> (i32, i32) {
    %c0_i32 = arith.constant 0 : i32
    %c0_i32_0 = arith.constant 0 : i32
    return %c0_i32, %arg0 : i32, i32
  }
}

</mosaic_0001>

<bundles_post_ra>
// kernel: tpu_custom_call.1
= control target key start
LH: loop header
LB: loop body
LE: loop exit
PB: predicated region body
PF: predicated region fallthrough
CT: control target
= control target key end

     0   :  { %s3251_s0 = inlined_call_operand.hbm [shape: f32[8,32], index: 0, kind: input, shape index: {}]   ;;  %s3252_s1 = inlined_call_operand.hbm [shape: bf16[32,512], index: 1, kind: input, shape index: {}]   ;;  %s3253_s2 = inlined_call_operand.vmem [shape: f32[1,512], index: 2, kind: input, shape index: {}]   ;;  %s3254_s3 = inlined_call_operand.hbm [shape: bf16[512,512], index: 3, kind: input, shape index: {}]   ;;  %s3255_s4 = inlined_call_operand.vmem [shape: f32[1,512], index: 4, kind: input, shape index: {}]   ;;  %s3256_s5 = inlined_call_operand.hbm [shape: bf16[512,512], index: 5, kind: input, shape index: {}]   ;;  %s3257_s6 = inlined_call_operand.vmem [shape: f32[1,512], index: 6, kind: input, shape index: {}]   ;;  %s3258_s7 = inlined_call_operand.vmem [shape: f32[1,512], index: 7, kind: input, shape index: {}]   ;;  %s3259_s8 = inlined_call_operand.<no memory space> [shape: f32[1,1], index: 8, kind: input, shape index: {}]   ;;  %s3260_s9 = inlined_call_operand.hbm [shape: f32[1,8], index: 9, kind: output, shape index: {}]  }
   0x1   :  { %v14_v0 = vstv %s3259_s8 }
   0x2   :  { %15 = vst [vmem:[#allocation2] sm:$0x1] %v14_v0 }
   0x3   :  { %16 = vsyncpa [#allocation4], 0 }
   0x4   :  { %17 = vsyncpa [#allocation7], 0 }
   0x5   :  { %18 = vsyncpa [#allocation10], 0 }
   0x6   :  { %19 = vsyncpa [#allocation5], 0  ;;  %s3057_s11 = smov [#allocation6]   ;;  %s2939_s15 = scalar_lea.hbm %s3252_s1, 1024 }
   0x7   :  { %s35_s12 = sshll.u32 %s3057_s11, 4  ;;  %p2940_p0 = scmp.ne.s32.totalorder %s3252_s1, %s2939_s15  ;;  %s36_s12 = int_to_ptr.vmem [resolvable:$true] %s35_s12 }
   0x8   :  { %p2943_p1 = scmp.lt.u32.totalorder %s2939_s15, %s3252_s1 }
   0xa   :  { %p2945_p2 = pnand %p2943_p1, %p2940_p0 }
   0xc   :  { %2948 = shalt.err (!%p2945_p2)
}
   0xd   :  { %s2949_s8 = scalar_lea.vmem %s36_s12, 1024  ;;  %p2954_p4 = scmp.lt.s32.totalorder %s36_s12, %s36_s12 }
   0xe   :  { %p2950_p3 = scmp.ne.s32.totalorder %s36_s12, %s2949_s8  ;;  %p2955_p5 = scmp.lt.s32.totalorder %s2949_s8, %s2949_s8 }
  0x10   :  { %p2956_p6 = por %p2955_p5, %p2954_p4 }
  0x12   :  { %p2957_p7 = pnand %p2956_p6, %p2950_p3 }
  0x14   :  { %2960 = shalt.err (!%p2957_p7)
}
  0x15   :  { %s3058_s20 = smov 256   ;;  %s3059_s21 = smov 16  }
  0x16   :  { %41 = dma.hbm_to_vmem [thread:$0]  %s3252_s1, 1024, %s36_s12, [#allocation7], %s3058_s20, %s3058_s20, %s3059_s21  }
  0x17   :  { %s3060_s24 = smov [#allocation3]   ;;  %s3061_s26 = smov [#allocation8]  }
  0x18   :  { %s26_s25 = sshll.u32 %s3060_s24, 4  ;;  %s49_s27 = sshll.u32 %s3061_s26, 4  ;;  %s27_s25 = int_to_ptr.vmem [resolvable:$true] %s26_s25  ;;  %s50_s27 = int_to_ptr.vmem [resolvable:$true] %s49_s27 }
  0x19   :  { %s2961_s30 = scalar_lea.hbm %s3251_s0, 128 }
  0x1a   :  { %p2962_p8 = scmp.ne.s32.totalorder %s3251_s0, %s2961_s30  ;;  %p2965_p9 = scmp.lt.u32.totalorder %s2961_s30, %s3251_s0 }
  0x1c   :  { %p2967_p10 = pnand %p2965_p9, %p2962_p8 }
  0x1e   :  { %2970 = shalt.err (!%p2967_p10)
}
  0x1f   :  { %s2971_s1 = scalar_lea.vmem %s27_s25, 128  ;;  %p2976_p12 = scmp.lt.s32.totalorder %s27_s25, %s27_s25 }
  0x20   :  { %p2972_p11 = scmp.ne.s32.totalorder %s27_s25, %s2971_s1  ;;  %p2977_p13 = scmp.lt.s32.totalorder %s2971_s1, %s2971_s1 }
  0x22   :  { %p2978_p0 = por %p2977_p13, %p2976_p12 }
  0x24   :  { %p2979_p1 = pnand %p2978_p0, %p2972_p11 }
  0x26   :  { %2982 = shalt.err (!%p2979_p1)
}
  0x27   :  { %29 = dma.hbm_to_vmem [thread:$0]  %s3251_s0, 128, %s27_s25, [#allocation4]  }
  0x28   :  { %s2983_s18 = scalar_lea.hbm %s3254_s3, 16384 }
  0x29   :  { %p2984_p2 = scmp.ne.s32.totalorder %s3254_s3, %s2983_s18  ;;  %p2987_p3 = scmp.lt.u32.totalorder %s2983_s18, %s3254_s3 }
  0x2b   :  { %p2989_p4 = pnand %p2987_p3, %p2984_p2 }
  0x2d   :  { %2992 = shalt.err (!%p2989_p4)
}
  0x2e   :  { %s2993_s24 = scalar_lea.vmem %s50_s27, 16384  ;;  %p2998_p6 = scmp.lt.s32.totalorder %s50_s27, %s50_s27 }
  0x2f   :  { %p2994_p5 = scmp.ne.s32.totalorder %s50_s27, %s2993_s24  ;;  %p2999_p7 = scmp.lt.s32.totalorder %s2993_s24, %s2993_s24 }
  0x31   :  { %p3000_p8 = por %p2999_p7, %p2998_p6 }
  0x33   :  { %p3001_p9 = pnand %p3000_p8, %p2994_p5 }
  0x35   :  { %3004 = shalt.err (!%p3001_p9)
}
  0x36   :  { %55 = dma.hbm_to_vmem [thread:$0]  %s3254_s3, 16384, %s50_s27, [#allocation7], %s3058_s20, %s3058_s20, %s3059_s21  }
  0x37   :  { %s3062_s26 = smov [#allocation9]   ;;  %s3005_s10 = scalar_lea.hbm %s3256_s5, 16384 }
  0x38   :  { %s63_s28 = sshll.u32 %s3062_s26, 4  ;;  %p3006_p10 = scmp.ne.s32.totalorder %s3256_s5, %s3005_s10  ;;  %s64_s28 = int_to_ptr.vmem [resolvable:$true] %s63_s28 }
  0x39   :  { %p3009_p11 = scmp.lt.u32.totalorder %s3005_s10, %s3256_s5 }
  0x3b   :  { %p3011_p12 = pnand %p3009_p11, %p3006_p10 }
  0x3d   :  { %3014 = shalt.err (!%p3011_p12)
}
  0x3e   :  { %s3015_s12 = scalar_lea.vmem %s64_s28, 16384  ;;  %p3020_p0 = scmp.lt.s32.totalorder %s64_s28, %s64_s28 }
  0x3f   :  { %p3016_p13 = scmp.ne.s32.totalorder %s64_s28, %s3015_s12  ;;  %p3021_p1 = scmp.lt.s32.totalorder %s3015_s12, %s3015_s12 }
  0x41   :  { %p3022_p2 = por %p3021_p1, %p3020_p0 }
  0x43   :  { %p3023_p3 = pnand %p3022_p2, %p3016_p13 }
  0x45   :  { %3026 = shalt.err (!%p3023_p3)
}
  0x46   :  { %69 = dma.hbm_to_vmem [thread:$0]  %s3256_s5, 16384, %s64_s28, [#allocation10], %s3058_s20, %s3058_s20, %s3059_s21  }
  0x47   :  { %3049 = dma.done.wait [#allocation4], 128  }
  0x48   :  { %3050 = vsyncadd [#allocation4], 4294967168 }
  0x49   :  { %3051 = dma.done.wait [#allocation7], 17408  }
  0x4a   :  { %3052 = vsyncadd [#allocation7], 4294949888 }
  0x4b   :  { %3053 = dma.done.wait [#allocation10], 16384  }
  0x4c   :  { %3054 = vsyncadd [#allocation10], 4294950912  ;;  %v3063_v1 = vmov 0   ;;  %v2543_v2 = vld [vmem:[#allocation6 + $0x4] ss:$16 sps:$4 sm:$0xff]   ;;  %v89_v6 = vld [vmem:[#allocation3] sm:$0xff] }
  0x4d   :  { %197 = vmatprep.mubr.bf16.mxu0 %v3063_v1  ;;  %238 = vmatprep.mubr.bf16.mxu1 %v3063_v1  ;;  %v2545_v3 = vld [vmem:[#allocation6] ss:$16 sps:$4 sm:$0xff]   ;;  %v2546_v4 = vld [vmem:[#allocation6 + $0x24] ss:$16 sps:$4 sm:$0xff]   ;;  %v2549_v7 = vld [vmem:[#allocation6 + $0xc] ss:$16 sps:$4 sm:$0xff]   ;;  %v90_v10 = vpack.c.bf16 %v89_v6, %v89_v6 }
  0x4e   :  { %2542 = vset.pattern.permute.xlu0 %v3063_v1  ;;  %165 = vmatprep.subr.bf16.mxu0 %v2543_v2  ;;  %v2548_v5 = vld [vmem:[#allocation6 + $0x20] ss:$16 sps:$4 sm:$0xff]   ;;  %v2551_v8 = vld [vmem:[#allocation6 + $0x8] ss:$16 sps:$4 sm:$0xff]   ;;  %v2552_v9 = vld [vmem:[#allocation6 + $0x2c] ss:$16 sps:$4 sm:$0xff]  }
  0x4f   :  { %166 = vmatpush1.bf16.msra.mxu0 %v2545_v3  ;;  %206 = vmatprep.subr.bf16.mxu1 %v2549_v7  ;;  %v2554_v11 = vld [vmem:[#allocation6 + $0x28] ss:$16 sps:$4 sm:$0xff]   ;;  %v2557_v12 = vld [vmem:[#allocation8 + $0x4] ss:$16 sps:$4 sm:$0xff]   ;;  %vm161_vm0 = vcmask 261120   ;;  %vm2225_vm1 = vcmask 57344  }
  0x50   :  { %167 = vmatprep.subr.bf16.mxu0 %v2546_v4  ;;  %207 = vmatpush1.bf16.msra.mxu1 %v2551_v8  ;;  %v2555_v13 = vld [vmem:[#allocation8] ss:$16 sps:$4 sm:$0xff]   ;;  %v2560_v14 = vld [vmem:[#allocation8 + $0xc] ss:$16 sps:$4 sm:$0xff]   ;;  %v2563_v15 = vld [vmem:[#allocation8 + $0x24] ss:$16 sps:$4 sm:$0xff]  }
  0x51   :  { %208 = vmatprep.subr.bf16.mxu1 %v2552_v9  ;;  %v2558_v16 = vld [vmem:[#allocation8 + $0x8] ss:$16 sps:$4 sm:$0xff]   ;;  %v2561_v17 = vld [vmem:[#allocation8 + $0x20] ss:$16 sps:$4 sm:$0xff]   ;;  %v2566_v18 = vld [vmem:[#allocation8 + $0x2c] ss:$16 sps:$4 sm:$0xff]  }
  0x52   :  { %v2569_v19 = vld [vmem:[#allocation8 + $0x44] ss:$16 sps:$4 sm:$0xff]   ;;  %v2564_v20 = vld [vmem:[#allocation8 + $0x28] ss:$16 sps:$4 sm:$0xff]   ;;  %v2567_v21 = vld [vmem:[#allocation8 + $0x40] ss:$16 sps:$4 sm:$0xff]  }
  0x53   :  { %168 = vmatpush1.bf16.msra.mxu0 %v2548_v5  ;;  %v2572_v22 = vld [vmem:[#allocation8 + $0x4c] ss:$16 sps:$4 sm:$0xff]   ;;  %v2575_v23 = vld [vmem:[#allocation8 + $0x64] ss:$16 sps:$4 sm:$0xff]   ;;  %v2570_v24 = vld [vmem:[#allocation8 + $0x48] ss:$16 sps:$4 sm:$0xff]  }
  0x54   :  { %1045 = vmatprep.subr.bf16.mxu0 %v2557_v12  ;;  %209 = vmatpush1.bf16.msra.mxu1 %v2554_v11  ;;  %v2573_v25 = vld [vmem:[#allocation8 + $0x60] ss:$16 sps:$4 sm:$0xff]   ;;  %v2578_v26 = vld [vmem:[#allocation8 + $0x6c] ss:$16 sps:$4 sm:$0xff]   ;;  %v2581_v27 = vld [vmem:[#allocation8 + $0x84] ss:$16 sps:$4 sm:$0xff]  }
  0x55   :  { %1127 = vmatprep.subr.bf16.mxu1 %v2560_v14  ;;  %v2576_v28 = vld [vmem:[#allocation8 + $0x68] ss:$16 sps:$4 sm:$0xff]   ;;  %v2579_v29 = vld [vmem:[#allocation8 + $0x80] ss:$16 sps:$4 sm:$0xff]   ;;  %v2584_v30 = vld [vmem:[#allocation8 + $0x8c] ss:$16 sps:$4 sm:$0xff]   ;;  %v101_v14 = vlaneseq }
  0x56   :  { %2252 = vmatmul.mubr.msk.bf16.vlgmr.msra.gmra.mrb[0].mxu0 %vm161_vm0, %v90_v10  ;;  %v2587_v31 = vld [vmem:[#allocation8 + $0xa4] ss:$16 sps:$4 sm:$0xff]   ;;  %v2582_v32 = vld [vmem:[#allocation8 + $0x88] ss:$16 sps:$4 sm:$0xff]   ;;  %v2585_v33 = vld [vmem:[#allocation8 + $0xa0] ss:$16 sps:$4 sm:$0xff]  }
  0x57   :  { %1046 = vmatpush1.bf16.msra.mxu0 %v2555_v13  ;;  %2253 = vmatmul.mubr.msk.bf16.vlgmr.msra.gmra.mrb[0].mxu1 %vm161_vm0, %v90_v10  ;;  %v2590_v34 = vld [vmem:[#allocation8 + $0xac] ss:$16 sps:$4 sm:$0xff]   ;;  %v2593_v35 = vld [vmem:[#allocation8 + $0xc4] ss:$16 sps:$4 sm:$0xff]   ;;  %v2588_v36 = vld [vmem:[#allocation8 + $0xa8] ss:$16 sps:$4 sm:$0xff]  }
  0x58   :  { %1047 = vmatprep.subr.bf16.mxu0 %v2563_v15  ;;  %1128 = vmatpush1.bf16.msra.mxu1 %v2558_v16  ;;  %v2591_v37 = vld [vmem:[#allocation8 + $0xc0] ss:$16 sps:$4 sm:$0xff]   ;;  %v2596_v38 = vld [vmem:[#allocation8 + $0xcc] ss:$16 sps:$4 sm:$0xff]   ;;  %v2599_v39 = vld [vmem:[#allocation8 + $0xe4] ss:$16 sps:$4 sm:$0xff]  }
  0x59   :  { %1129 = vmatprep.subr.bf16.mxu1 %v2566_v18  ;;  %v2594_v40 = vld [vmem:[#allocation8 + $0xc8] ss:$16 sps:$4 sm:$0xff]   ;;  %v2597_v41 = vld [vmem:[#allocation8 + $0xe0] ss:$16 sps:$4 sm:$0xff]   ;;  %v2602_v42 = vld [vmem:[#allocation8 + $0xec] ss:$16 sps:$4 sm:$0xff]  }
  0x5a   :  { %v2605_v43 = vld [vmem:[#allocation8 + $0x104] ss:$16 sps:$4 sm:$0xff]   ;;  %v2600_v44 = vld [vmem:[#allocation8 + $0xe8] ss:$16 sps:$4 sm:$0xff]   ;;  %v2603_v45 = vld [vmem:[#allocation8 + $0x100] ss:$16 sps:$4 sm:$0xff]  }
  0x5b   :  { %1048 = vmatpush1.bf16.msra.mxu0 %v2561_v17  ;;  %v2608_v46 = vld [vmem:[#allocation8 + $0x10c] ss:$16 sps:$4 sm:$0xff]   ;;  %v2611_v47 = vld [vmem:[#allocation8 + $0x124] ss:$16 sps:$4 sm:$0xff]   ;;  %v2606_v48 = vld [vmem:[#allocation8 + $0x108] ss:$16 sps:$4 sm:$0xff]  }
  0x5c   :  { %1049 = vmatprep.subr.bf16.mxu0 %v2569_v19  ;;  %1130 = vmatpush1.bf16.msra.mxu1 %v2564_v20  ;;  %v2609_v49 = vld [vmem:[#allocation8 + $0x120] ss:$16 sps:$4 sm:$0xff]   ;;  %v2614_v50 = vld [vmem:[#allocation8 + $0x12c] ss:$16 sps:$4 sm:$0xff]   ;;  %v2617_v51 = vld [vmem:[#allocation8 + $0x144] ss:$16 sps:$4 sm:$0xff]  }
  0x5d   :  { %1131 = vmatprep.subr.bf16.mxu1 %v2572_v22  ;;  %v2612_v52 = vld [vmem:[#allocation8 + $0x128] ss:$16 sps:$4 sm:$0xff]   ;;  %v2615_v53 = vld [vmem:[#allocation8 + $0x140] ss:$16 sps:$4 sm:$0xff]   ;;  %v2620_v54 = vld [vmem:[#allocation8 + $0x14c] ss:$16 sps:$4 sm:$0xff]  }
  0x5e   :  { %v2623_v55 = vld [vmem:[#allocation8 + $0x164] ss:$16 sps:$4 sm:$0xff]   ;;  %v2618_v56 = vld [vmem:[#allocation8 + $0x148] ss:$16 sps:$4 sm:$0xff]   ;;  %v2621_v57 = vld [vmem:[#allocation8 + $0x160] ss:$16 sps:$4 sm:$0xff]  }
  0x5f   :  { %1050 = vmatpush1.bf16.msra.mxu0 %v2567_v21  ;;  %v2626_v58 = vld [vmem:[#allocation8 + $0x16c] ss:$16 sps:$4 sm:$0xff]   ;;  %v2629_v59 = vld [vmem:[#allocation8 + $0x184] ss:$16 sps:$4 sm:$0xff]   ;;  %v2624_v60 = vld [vmem:[#allocation8 + $0x168] ss:$16 sps:$4 sm:$0xff]  }
  0x60   :  { %1051 = vmatprep.subr.bf16.mxu0 %v2575_v23  ;;  %1132 = vmatpush1.bf16.msra.mxu1 %v2570_v24  ;;  %v2627_v61 = vld [vmem:[#allocation8 + $0x180] ss:$16 sps:$4 sm:$0xff]   ;;  %v2632_v62 = vld [vmem:[#allocation8 + $0x18c] ss:$16 sps:$4 sm:$0xff]   ;;  %v2635_v63 = vld [vmem:[#allocation8 + $0x1a4] ss:$16 sps:$4 sm:$0xff]  }
  0x61   :  { %1133 = vmatprep.subr.bf16.mxu1 %v2578_v26  ;;  %v2630_v0 = vld [vmem:[#allocation8 + $0x188] ss:$16 sps:$4 sm:$0xff]   ;;  %v2633_v1 = vld [vmem:[#allocation8 + $0x1a0] ss:$16 sps:$4 sm:$0xff]   ;;  %v2638_v2 = vld [vmem:[#allocation8 + $0x1ac] ss:$16 sps:$4 sm:$0xff]  }
  0x62   :  { %v2636_v3 = vld [vmem:[#allocation8 + $0x1a8] ss:$16 sps:$4 sm:$0xff]   ;;  %v2641_v4 = vld [vmem:[#allocation8 + $0x1c4] ss:$16 sps:$4 sm:$0xff]   ;;  %v2644_v5 = vld [vmem:[#allocation8 + $0x1cc] ss:$16 sps:$4 sm:$0xff]  }
  0x63   :  { %1052 = vmatpush1.bf16.msra.mxu0 %v2573_v25  ;;  %v2639_v6 = vld [vmem:[#allocation8 + $0x1c0] ss:$16 sps:$4 sm:$0xff]   ;;  %v2642_v7 = vld [vmem:[#allocation8 + $0x1c8] ss:$16 sps:$4 sm:$0xff]   ;;  %v2647_v8 = vld [vmem:[#allocation8 + $0x1e4] ss:$16 sps:$4 sm:$0xff]  }
  0x64   :  { %1053 = vmatprep.subr.bf16.mxu0 %v2581_v27  ;;  %1134 = vmatpush1.bf16.msra.mxu1 %v2576_v28  ;;  %v2650_v9 = vld [vmem:[#allocation8 + $0x1ec] ss:$16 sps:$4 sm:$0xff]   ;;  %v2645_v10 = vld [vmem:[#allocation8 + $0x1e0] ss:$16 sps:$4 sm:$0xff]   ;;  %v2648_v11 = vld [vmem:[#allocation8 + $0x1e8] ss:$16 sps:$4 sm:$0xff]  }
  0x65   :  { %1135 = vmatprep.subr.bf16.mxu1 %v2584_v30  ;;  %v2653_v12 = vld [vmem:[#allocation8 + $0x204] ss:$16 sps:$4 sm:$0xff]   ;;  %v2656_v13 = vld [vmem:[#allocation8 + $0x20c] ss:$16 sps:$4 sm:$0xff]   ;;  %v3176_v15 = vshrl.u32 %v101_v14, 7 }
  0x66   :  { %v3184_v17 = vld [vmem:[%s3253_s2] sm:$0xf] }
  0x67   :  { %1054 = vmatpush1.bf16.msra.mxu0 %v2579_v29  ;;  %v3179_v16 = vsub.s32 0, %v3176_v15  ;;  %v3187_v18 = vsub.s32 1, %v3176_v15  ;;  %v3192_v20 = vsub.s32 3, %v3176_v15 }
  0x68   :  { %1055 = vmatprep.subr.bf16.mxu0 %v2587_v31  ;;  %1136 = vmatpush1.bf16.msra.mxu1 %v2582_v32 }
  0x69   :  { %1137 = vmatprep.subr.bf16.mxu1 %v2590_v34  ;;  %v104_v19 = vrot.slane %v3184_v17, %v3179_v16  ;;  %v108_v21 = vrot.slane %v3184_v17, %v3187_v18  ;;  %v116_v25 = vrot.slane %v3184_v17, %v3192_v20 }
  0x6b   :  { %1056 = vmatpush1.bf16.msra.mxu0 %v2585_v33 }
  0x6c   :  { %1057 = vmatprep.subr.bf16.mxu0 %v2593_v35  ;;  %1138 = vmatpush1.bf16.msra.mxu1 %v2588_v36  ;;  %v2651_v36 = vld [vmem:[#allocation8 + $0x200] ss:$16 sps:$4 sm:$0xff]  }
  0x6d   :  { %1139 = vmatprep.subr.bf16.mxu1 %v2596_v38 }
  0x6f   :  { %1058 = vmatpush1.bf16.msra.mxu0 %v2591_v37  ;;  %v2654_v37 = vld [vmem:[#allocation8 + $0x208] ss:$16 sps:$4 sm:$0xff]  }
  0x70   :  { %1059 = vmatprep.subr.bf16.mxu0 %v2599_v39  ;;  %1140 = vmatpush1.bf16.msra.mxu1 %v2594_v40  ;;  %v2659_v40 = vld [vmem:[#allocation8 + $0x224] ss:$16 sps:$4 sm:$0xff]  }
  0x71   :  { %1141 = vmatprep.subr.bf16.mxu1 %v2602_v42 }
  0x73   :  { %1060 = vmatpush1.bf16.msra.mxu0 %v2597_v41  ;;  %v2662_v41 = vld [vmem:[#allocation8 + $0x22c] ss:$16 sps:$4 sm:$0xff]  }
  0x74   :  { %1061 = vmatprep.subr.bf16.mxu0 %v2605_v43  ;;  %1142 = vmatpush1.bf16.msra.mxu1 %v2600_v44  ;;  %v2657_v44 = vld [vmem:[#allocation8 + $0x220] ss:$16 sps:$4 sm:$0xff]  }
  0x75   :  { %1143 = vmatprep.subr.bf16.mxu1 %v2608_v46  ;;  %v2665_v46 = vld [vmem:[#allocation8 + $0x244] ss:$16 sps:$4 sm:$0xff]  }
  0x77   :  { %1062 = vmatpush1.bf16.msra.mxu0 %v2603_v45  ;;  %v2660_v45 = vld [vmem:[#allocation8 + $0x228] ss:$16 sps:$4 sm:$0xff]  }
  0x78   :  { %1063 = vmatprep.subr.bf16.mxu0 %v2611_v47  ;;  %1144 = vmatpush1.bf16.msra.mxu1 %v2606_v48  ;;  %v2668_v47 = vld [vmem:[#allocation8 + $0x24c] ss:$16 sps:$4 sm:$0xff]   ;;  %v2663_v48 = vld [vmem:[#allocation8 + $0x240] ss:$16 sps:$4 sm:$0xff]  }
  0x79   :  { %1145 = vmatprep.subr.bf16.mxu1 %v2614_v50  ;;  %v2671_v50 = vld [vmem:[#allocation8 + $0x264] ss:$16 sps:$4 sm:$0xff]  }
  0x7b   :  { %1064 = vmatpush1.bf16.msra.mxu0 %v2609_v49  ;;  %v2666_v49 = vld [vmem:[#allocation8 + $0x248] ss:$16 sps:$4 sm:$0xff]  }
  0x7c   :  { %1065 = vmatprep.subr.bf16.mxu0 %v2617_v51  ;;  %1146 = vmatpush1.bf16.msra.mxu1 %v2612_v52  ;;  %v2674_v51 = vld [vmem:[#allocation8 + $0x26c] ss:$16 sps:$4 sm:$0xff]   ;;  %v2669_v52 = vld [vmem:[#allocation8 + $0x260] ss:$16 sps:$4 sm:$0xff]  }
  0x7d   :  { %1147 = vmatprep.subr.bf16.mxu1 %v2620_v54  ;;  %v2677_v54 = vld [vmem:[#allocation8 + $0x284] ss:$16 sps:$4 sm:$0xff]  }
  0x7f   :  { %1066 = vmatpush1.bf16.msra.mxu0 %v2615_v53  ;;  %v2672_v53 = vld [vmem:[#allocation8 + $0x268] ss:$16 sps:$4 sm:$0xff]  }
  0x80   :  { %1067 = vmatprep.subr.bf16.mxu0 %v2623_v55  ;;  %1148 = vmatpush1.bf16.msra.mxu1 %v2618_v56  ;;  %v2680_v55 = vld [vmem:[#allocation8 + $0x28c] ss:$16 sps:$4 sm:$0xff]   ;;  %v2675_v56 = vld [vmem:[#allocation8 + $0x280] ss:$16 sps:$4 sm:$0xff]  }
  0x81   :  { %1149 = vmatprep.subr.bf16.mxu1 %v2626_v58  ;;  %v2683_v58 = vld [vmem:[#allocation8 + $0x2a4] ss:$16 sps:$4 sm:$0xff]  }
  0x83   :  { %1068 = vmatpush1.bf16.msra.mxu0 %v2621_v57  ;;  %v2678_v57 = vld [vmem:[#allocation8 + $0x288] ss:$16 sps:$4 sm:$0xff]  }
  0x84   :  { %1069 = vmatprep.subr.bf16.mxu0 %v2629_v59  ;;  %1150 = vmatpush1.bf16.msra.mxu1 %v2624_v60  ;;  %v2686_v59 = vld [vmem:[#allocation8 + $0x2ac] ss:$16 sps:$4 sm:$0xff]   ;;  %v2681_v60 = vld [vmem:[#allocation8 + $0x2a0] ss:$16 sps:$4 sm:$0xff]  }
  0x85   :  { %1151 = vmatprep.subr.bf16.mxu1 %v2632_v62  ;;  %v2689_v62 = vld [vmem:[#allocation8 + $0x2c4] ss:$16 sps:$4 sm:$0xff]  }
  0x87   :  { %1070 = vmatpush1.bf16.msra.mxu0 %v2627_v61  ;;  %v2684_v61 = vld [vmem:[#allocation8 + $0x2a8] ss:$16 sps:$4 sm:$0xff]  }
  0x88   :  { %1071 = vmatprep.subr.bf16.mxu0 %v2635_v63  ;;  %1152 = vmatpush1.bf16.msra.mxu1 %v2630_v0  ;;  %v2692_v63 = vld [vmem:[#allocation8 + $0x2cc] ss:$16 sps:$4 sm:$0xff]   ;;  %v2687_v0 = vld [vmem:[#allocation8 + $0x2c0] ss:$16 sps:$4 sm:$0xff]  }
  0x89   :  { %1153 = vmatprep.subr.bf16.mxu1 %v2638_v2  ;;  %v2695_v2 = vld [vmem:[#allocation8 + $0x2e4] ss:$16 sps:$4 sm:$0xff]  }
  0x8b   :  { %1072 = vmatpush1.bf16.msra.mxu0 %v2633_v1  ;;  %v2690_v1 = vld [vmem:[#allocation8 + $0x2c8] ss:$16 sps:$4 sm:$0xff]  }
  0x8c   :  { %1154 = vmatpush1.bf16.msra.mxu1 %v2636_v3  ;;  %1073 = vmatprep.subr.bf16.mxu0 %v2641_v4  ;;  %v2698_v3 = vld [vmem:[#allocation8 + $0x2ec] ss:$16 sps:$4 sm:$0xff]   ;;  %v2693_v4 = vld [vmem:[#allocation8 + $0x2e0] ss:$16 sps:$4 sm:$0xff]  }
  0x8d   :  { %1155 = vmatprep.subr.bf16.mxu1 %v2644_v5  ;;  %v2696_v5 = vld [vmem:[#allocation8 + $0x2e8] ss:$16 sps:$4 sm:$0xff]  }
  0x8f   :  { %1074 = vmatpush1.bf16.msra.mxu0 %v2639_v6  ;;  %v2701_v6 = vld [vmem:[#allocation8 + $0x304] ss:$16 sps:$4 sm:$0xff]  }
  0x90   :  { %1156 = vmatpush1.bf16.msra.mxu1 %v2642_v7  ;;  %1075 = vmatprep.subr.bf16.mxu0 %v2647_v8  ;;  %v2704_v7 = vld [vmem:[#allocation8 + $0x30c] ss:$16 sps:$4 sm:$0xff]   ;;  %v2699_v8 = vld [vmem:[#allocation8 + $0x300] ss:$16 sps:$4 sm:$0xff]  }
  0x91   :  { %1157 = vmatprep.subr.bf16.mxu1 %v2650_v9  ;;  %v2702_v9 = vld [vmem:[#allocation8 + $0x308] ss:$16 sps:$4 sm:$0xff]  }
  0x93   :  { %1076 = vmatpush1.bf16.msra.mxu0 %v2645_v10  ;;  %v2707_v10 = vld [vmem:[#allocation8 + $0x324] ss:$16 sps:$4 sm:$0xff]  }
  0x94   :  { %1158 = vmatpush1.bf16.msra.mxu1 %v2648_v11  ;;  %1086 = vmatprep.subr.bf16.mxu0 %v2653_v12  ;;  %v2710_v11 = vld [vmem:[#allocation8 + $0x32c] ss:$16 sps:$4 sm:$0xff]   ;;  %v2705_v12 = vld [vmem:[#allocation8 + $0x320] ss:$16 sps:$4 sm:$0xff]  }
  0x95   :  { %1168 = vmatprep.subr.bf16.mxu1 %v2656_v13  ;;  %v2708_v13 = vld [vmem:[#allocation8 + $0x328] ss:$16 sps:$4 sm:$0xff]  }
 0x129   :  { %v199_v22 = vpop.f32.mrb[0].mxu0 }
 0x12a   :  { %v200_v23 = vadd.f32 %v199_v22, %v104_v19  ;;  %v201_v24 = vpop.f32.mrb[1].mxu0  ;;  %v3198_v30 = vpop.f32.mrb[0].mxu1  ;;  %v2713_v19 = vld [vmem:[#allocation8 + $0x344] ss:$16 sps:$4 sm:$0xff]   ;;  %v2711_v22 = vld [vmem:[#allocation8 + $0x340] ss:$16 sps:$4 sm:$0xff]  }
 0x12b   :  { %v202_v26 = vadd.f32 %v201_v24, %v108_v21  ;;  %v203_v27 = vpop.f32.mrb[2].mxu0  ;;  %v242_v32 = vpop.f32.mrb[1].mxu1  ;;  %v2716_v21 = vld [vmem:[#allocation8 + $0x34c] ss:$16 sps:$4 sm:$0xff]   ;;  %v2719_v24 = vld [vmem:[#allocation8 + $0x364] ss:$16 sps:$4 sm:$0xff]  }
 0x12c   :  { %v247_v28 = vmax.f32 %v200_v23, 0.0  ;;  %v204_v29 = vpop.f32.mrb[3].mxu0  ;;  %v243_v33 = vadd.f32 %v242_v32, %v116_v25  ;;  %v244_v34 = vpop.f32.mrb[2].mxu1  ;;  %v2714_v23 = vld [vmem:[#allocation8 + $0x348] ss:$16 sps:$4 sm:$0xff]  }
 0x12d   :  { %v248_v31 = vmax.f32 %v202_v26, 0.0  ;;  %v245_v38 = vpop.f32.mrb[3].mxu1  ;;  %v2722_v25 = vld [vmem:[#allocation8 + $0x36c] ss:$16 sps:$4 sm:$0xff]   ;;  %v2717_v26 = vld [vmem:[#allocation8 + $0x360] ss:$16 sps:$4 sm:$0xff]  }
 0x12e   :  { %v251_v39 = vpack.c.bf16 %v247_v28, %v247_v28  ;;  %v250_v42 = vmax.f32 %v243_v33, 0.0  ;;  %v2720_v27 = vld [vmem:[#allocation8 + $0x368] ss:$16 sps:$4 sm:$0xff]   ;;  %v2725_v28 = vld [vmem:[#allocation8 + $0x384] ss:$16 sps:$4 sm:$0xff]   ;;  %v3201_v33 = vsub.s32 2, %v3176_v15 }
 0x12f   :  { %v252_v35 = vpack.c.bf16 %v248_v31, %v248_v31  ;;  %v2728_v29 = vld [vmem:[#allocation8 + $0x38c] ss:$16 sps:$4 sm:$0xff]   ;;  %v2723_v31 = vld [vmem:[#allocation8 + $0x380] ss:$16 sps:$4 sm:$0xff]   ;;  %v2726_v32 = vld [vmem:[#allocation8 + $0x388] ss:$16 sps:$4 sm:$0xff]  }
 0x130   :  { %v254_v43 = vpack.c.bf16 %v250_v42, %v250_v42  ;;  %v2731_v34 = vld [vmem:[#allocation8 + $0x3a4] ss:$16 sps:$4 sm:$0xff]   ;;  %v112_v38 = vrot.slane %v3184_v17, %v3201_v33  ;;  %v2738_v42 = vld [vmem:[#allocation8 + $0x3c8] ss:$16 sps:$4 sm:$0xff]  }
 0x131   :  { %1077 = vmatprep.mubr.bf16.mxu0 %v252_v35  ;;  %1159 = vmatprep.mubr.bf16.mxu1 %v252_v35  ;;  %v2734_v35 = vld [vmem:[#allocation8 + $0x3ac] ss:$16 sps:$4 sm:$0xff]   ;;  %v2749_v17 = vld [vmem:[#allocation9 + $0x4] ss:$16 sps:$4 sm:$0xff]  }
 0x132   :  { %1078 = vmatmul.mubr.bf16.vlgmr.msra.gmra.mrb[4].mxu0 %v251_v39  ;;  %1160 = vmatmul.mubr.bf16.vlgmr.msra.gmra.mrb[4].mxu1 %v251_v39  ;;  %v2737_v39 = vld [vmem:[#allocation8 + $0x3c4] ss:$16 sps:$4 sm:$0xff]  }
 0x133   :  { %1087 = vmatpush1.bf16.msra.mxu0 %v2651_v36  ;;  %1169 = vmatpush1.bf16.msra.mxu1 %v2654_v37  ;;  %v2729_v36 = vld [vmem:[#allocation8 + $0x3a0] ss:$16 sps:$4 sm:$0xff]   ;;  %v2732_v37 = vld [vmem:[#allocation8 + $0x3a8] ss:$16 sps:$4 sm:$0xff]  }
 0x134   :  { %1088 = vmatprep.subr.bf16.mxu0 %v2659_v40  ;;  %1170 = vmatprep.subr.bf16.mxu1 %v2662_v41  ;;  %v2740_v40 = vld [vmem:[#allocation8 + $0x3cc] ss:$16 sps:$4 sm:$0xff]   ;;  %v2735_v41 = vld [vmem:[#allocation8 + $0x3c0] ss:$16 sps:$4 sm:$0xff]  }
 0x135   :  { %1118 = vmatprep.mubr.bf16.mxu0 %v254_v43  ;;  %1200 = vmatprep.mubr.bf16.mxu1 %v254_v43  ;;  %v241_v43 = vadd.f32 %v3198_v30, %v112_v38  ;;  %v2755_v30 = vld [vmem:[#allocation9 + $0x24] ss:$16 sps:$4 sm:$0xff]   ;;  %v2813_v38 = vld [vmem:[#allocation9 + $0x160] ss:$16 sps:$4 sm:$0xff]  }
 0x137   :  { %1089 = vmatpush1.bf16.msra.mxu0 %v2657_v44  ;;  %1171 = vmatpush1.bf16.msra.mxu1 %v2660_v45  ;;  %v2743_v44 = vld [vmem:[#allocation8 + $0x3e4] ss:$16 sps:$4 sm:$0xff]   ;;  %v2746_v45 = vld [vmem:[#allocation8 + $0x3ec] ss:$16 sps:$4 sm:$0xff]  }
 0x138   :  { %1090 = vmatprep.subr.bf16.mxu0 %v2665_v46  ;;  %1172 = vmatprep.subr.bf16.mxu1 %v2668_v47  ;;  %v2741_v46 = vld [vmem:[#allocation8 + $0x3e0] ss:$16 sps:$4 sm:$0xff]   ;;  %v2744_v47 = vld [vmem:[#allocation8 + $0x3e8] ss:$16 sps:$4 sm:$0xff]  }
 0x13b   :  { %1091 = vmatpush1.bf16.msra.mxu0 %v2663_v48  ;;  %1173 = vmatpush1.bf16.msra.mxu1 %v2666_v49  ;;  %v249_v48 = vmax.f32 %v241_v43, 0.0  ;;  %v2752_v49 = vld [vmem:[#allocation9 + $0xc] ss:$16 sps:$4 sm:$0xff]   ;;  %v2822_v43 = vld [vmem:[#allocation9 + $0x188] ss:$16 sps:$4 sm:$0xff]  }
 0x13c   :  { %1092 = vmatprep.subr.bf16.mxu0 %v2671_v50  ;;  %1174 = vmatprep.subr.bf16.mxu1 %v2674_v51  ;;  %v2747_v50 = vld [vmem:[#allocation9] ss:$16 sps:$4 sm:$0xff]   ;;  %v2750_v51 = vld [vmem:[#allocation9 + $0x8] ss:$16 sps:$4 sm:$0xff]  }
 0x13f   :  { %1093 = vmatpush1.bf16.msra.mxu0 %v2669_v52  ;;  %1175 = vmatpush1.bf16.msra.mxu1 %v2672_v53  ;;  %v253_v52 = vpack.c.bf16 %v249_v48, %v249_v48  ;;  %v2758_v53 = vld [vmem:[#allocation9 + $0x2c] ss:$16 sps:$4 sm:$0xff]   ;;  %v2833_v48 = vld [vmem:[#allocation9 + $0x1c4] ss:$16 sps:$4 sm:$0xff]  }
 0x140   :  { %1094 = vmatprep.subr.bf16.mxu0 %v2677_v54  ;;  %1176 = vmatprep.subr.bf16.mxu1 %v2680_v55  ;;  %v2753_v54 = vld [vmem:[#allocation9 + $0x20] ss:$16 sps:$4 sm:$0xff]   ;;  %v2756_v55 = vld [vmem:[#allocation9 + $0x28] ss:$16 sps:$4 sm:$0xff]  }
 0x143   :  { %1095 = vmatpush1.bf16.msra.mxu0 %v2675_v56  ;;  %1177 = vmatpush1.bf16.msra.mxu1 %v2678_v57  ;;  %v2761_v56 = vld [vmem:[#allocation9 + $0x44] ss:$16 sps:$4 sm:$0xff]   ;;  %v2764_v57 = vld [vmem:[#allocation9 + $0x4c] ss:$16 sps:$4 sm:$0xff]  }
 0x144   :  { %1096 = vmatprep.subr.bf16.mxu0 %v2683_v58  ;;  %1178 = vmatprep.subr.bf16.mxu1 %v2686_v59  ;;  %v2759_v58 = vld [vmem:[#allocation9 + $0x40] ss:$16 sps:$4 sm:$0xff]   ;;  %v2762_v59 = vld [vmem:[#allocation9 + $0x48] ss:$16 sps:$4 sm:$0xff]  }
 0x147   :  { %1097 = vmatpush1.bf16.msra.mxu0 %v2681_v60  ;;  %1179 = vmatpush1.bf16.msra.mxu1 %v2684_v61  ;;  %v2767_v60 = vld [vmem:[#allocation9 + $0x64] ss:$16 sps:$4 sm:$0xff]   ;;  %v2770_v61 = vld [vmem:[#allocation9 + $0x6c] ss:$16 sps:$4 sm:$0xff]  }
 0x148   :  { %1098 = vmatprep.subr.bf16.mxu0 %v2689_v62  ;;  %1180 = vmatprep.subr.bf16.mxu1 %v2692_v63  ;;  %v2765_v62 = vld [vmem:[#allocation9 + $0x60] ss:$16 sps:$4 sm:$0xff]   ;;  %v2768_v63 = vld [vmem:[#allocation9 + $0x68] ss:$16 sps:$4 sm:$0xff]  }
 0x14b   :  { %1099 = vmatpush1.bf16.msra.mxu0 %v2687_v0  ;;  %1181 = vmatpush1.bf16.msra.mxu1 %v2690_v1  ;;  %v2773_v0 = vld [vmem:[#allocation9 + $0x84] ss:$16 sps:$4 sm:$0xff]   ;;  %v2776_v1 = vld [vmem:[#allocation9 + $0x8c] ss:$16 sps:$4 sm:$0xff]  }
 0x14c   :  { %1100 = vmatprep.subr.bf16.mxu0 %v2695_v2  ;;  %1182 = vmatprep.subr.bf16.mxu1 %v2698_v3  ;;  %v2771_v2 = vld [vmem:[#allocation9 + $0x80] ss:$16 sps:$4 sm:$0xff]   ;;  %v2774_v3 = vld [vmem:[#allocation9 + $0x88] ss:$16 sps:$4 sm:$0xff]  }
 0x14f   :  { %1101 = vmatpush1.bf16.msra.mxu0 %v2693_v4  ;;  %1183 = vmatpush1.bf16.msra.mxu1 %v2696_v5  ;;  %v2779_v4 = vld [vmem:[#allocation9 + $0xa4] ss:$16 sps:$4 sm:$0xff]   ;;  %v2782_v5 = vld [vmem:[#allocation9 + $0xac] ss:$16 sps:$4 sm:$0xff]  }
 0x150   :  { %1102 = vmatprep.subr.bf16.mxu0 %v2701_v6  ;;  %1184 = vmatprep.subr.bf16.mxu1 %v2704_v7  ;;  %v2777_v6 = vld [vmem:[#allocation9 + $0xa0] ss:$16 sps:$4 sm:$0xff]   ;;  %v2780_v7 = vld [vmem:[#allocation9 + $0xa8] ss:$16 sps:$4 sm:$0xff]  }
 0x153   :  { %1103 = vmatpush1.bf16.msra.mxu0 %v2699_v8  ;;  %1185 = vmatpush1.bf16.msra.mxu1 %v2702_v9  ;;  %v2785_v8 = vld [vmem:[#allocation9 + $0xc4] ss:$16 sps:$4 sm:$0xff]   ;;  %v2788_v9 = vld [vmem:[#allocation9 + $0xcc] ss:$16 sps:$4 sm:$0xff]  }
 0x154   :  { %1104 = vmatprep.subr.bf16.mxu0 %v2707_v10  ;;  %1186 = vmatprep.subr.bf16.mxu1 %v2710_v11  ;;  %v2783_v10 = vld [vmem:[#allocation9 + $0xc0] ss:$16 sps:$4 sm:$0xff]   ;;  %v2786_v11 = vld [vmem:[#allocation9 + $0xc8] ss:$16 sps:$4 sm:$0xff]  }
 0x157   :  { %1105 = vmatpush1.bf16.msra.mxu0 %v2705_v12  ;;  %1187 = vmatpush1.bf16.msra.mxu1 %v2708_v13  ;;  %v2791_v12 = vld [vmem:[#allocation9 + $0xe4] ss:$16 sps:$4 sm:$0xff]   ;;  %v2794_v13 = vld [vmem:[#allocation9 + $0xec] ss:$16 sps:$4 sm:$0xff]  }
 0x158   :  { %1106 = vmatprep.subr.bf16.mxu0 %v2713_v19  ;;  %1188 = vmatprep.subr.bf16.mxu1 %v2716_v21  ;;  %v2789_v19 = vld [vmem:[#allocation9 + $0xe0] ss:$16 sps:$4 sm:$0xff]   ;;  %v2792_v21 = vld [vmem:[#allocation9 + $0xe8] ss:$16 sps:$4 sm:$0xff]  }
 0x15b   :  { %1107 = vmatpush1.bf16.msra.mxu0 %v2711_v22  ;;  %1189 = vmatpush1.bf16.msra.mxu1 %v2714_v23  ;;  %v2797_v22 = vld [vmem:[#allocation9 + $0x104] ss:$16 sps:$4 sm:$0xff]   ;;  %v2800_v23 = vld [vmem:[#allocation9 + $0x10c] ss:$16 sps:$4 sm:$0xff]  }
 0x15c   :  { %1108 = vmatprep.subr.bf16.mxu0 %v2719_v24  ;;  %1190 = vmatprep.subr.bf16.mxu1 %v2722_v25  ;;  %v2795_v24 = vld [vmem:[#allocation9 + $0x100] ss:$16 sps:$4 sm:$0xff]   ;;  %v2798_v25 = vld [vmem:[#allocation9 + $0x108] ss:$16 sps:$4 sm:$0xff]  }
 0x15f   :  { %1109 = vmatpush1.bf16.msra.mxu0 %v2717_v26  ;;  %1191 = vmatpush1.bf16.msra.mxu1 %v2720_v27  ;;  %v2803_v26 = vld [vmem:[#allocation9 + $0x124] ss:$16 sps:$4 sm:$0xff]   ;;  %v2806_v27 = vld [vmem:[#allocation9 + $0x12c] ss:$16 sps:$4 sm:$0xff]  }
 0x160   :  { %1110 = vmatprep.subr.bf16.mxu0 %v2725_v28  ;;  %1192 = vmatprep.subr.bf16.mxu1 %v2728_v29  ;;  %v2801_v28 = vld [vmem:[#allocation9 + $0x120] ss:$16 sps:$4 sm:$0xff]   ;;  %v2804_v29 = vld [vmem:[#allocation9 + $0x128] ss:$16 sps:$4 sm:$0xff]  }
 0x163   :  { %1111 = vmatpush1.bf16.msra.mxu0 %v2723_v31  ;;  %1193 = vmatpush1.bf16.msra.mxu1 %v2726_v32  ;;  %v2809_v31 = vld [vmem:[#allocation9 + $0x144] ss:$16 sps:$4 sm:$0xff]   ;;  %v2812_v32 = vld [vmem:[#allocation9 + $0x14c] ss:$16 sps:$4 sm:$0xff]  }
 0x164   :  { %1112 = vmatprep.subr.bf16.mxu0 %v2731_v34  ;;  %1194 = vmatprep.subr.bf16.mxu1 %v2734_v35  ;;  %v2807_v34 = vld [vmem:[#allocation9 + $0x140] ss:$16 sps:$4 sm:$0xff]   ;;  %v2810_v35 = vld [vmem:[#allocation9 + $0x148] ss:$16 sps:$4 sm:$0xff]  }
 0x167   :  { %1113 = vmatpush1.bf16.msra.mxu0 %v2729_v36  ;;  %1195 = vmatpush1.bf16.msra.mxu1 %v2732_v37  ;;  %v2815_v36 = vld [vmem:[#allocation9 + $0x164] ss:$16 sps:$4 sm:$0xff]   ;;  %v2818_v37 = vld [vmem:[#allocation9 + $0x16c] ss:$16 sps:$4 sm:$0xff]  }
 0x168   :  { %1114 = vmatprep.subr.bf16.mxu0 %v2737_v39  ;;  %1196 = vmatprep.subr.bf16.mxu1 %v2740_v40  ;;  %v2816_v39 = vld [vmem:[#allocation9 + $0x168] ss:$16 sps:$4 sm:$0xff]   ;;  %v2821_v40 = vld [vmem:[#allocation9 + $0x184] ss:$16 sps:$4 sm:$0xff]  }
 0x16b   :  { %1115 = vmatpush1.bf16.msra.mxu0 %v2735_v41  ;;  %1197 = vmatpush1.bf16.msra.mxu1 %v2738_v42  ;;  %v2824_v41 = vld [vmem:[#allocation9 + $0x18c] ss:$16 sps:$4 sm:$0xff]   ;;  %v2819_v42 = vld [vmem:[#allocation9 + $0x180] ss:$16 sps:$4 sm:$0xff]  }
 0x16c   :  { %1116 = vmatprep.subr.bf16.mxu0 %v2743_v44  ;;  %1198 = vmatprep.subr.bf16.mxu1 %v2746_v45  ;;  %v2827_v44 = vld [vmem:[#allocation9 + $0x1a4] ss:$16 sps:$4 sm:$0xff]   ;;  %v2830_v45 = vld [vmem:[#allocation9 + $0x1ac] ss:$16 sps:$4 sm:$0xff]  }
 0x16f   :  { %1117 = vmatpush1.bf16.msra.mxu0 %v2741_v46  ;;  %1199 = vmatpush1.bf16.msra.mxu1 %v2744_v47  ;;  %v2825_v46 = vld [vmem:[#allocation9 + $0x1a0] ss:$16 sps:$4 sm:$0xff]   ;;  %v2828_v47 = vld [vmem:[#allocation9 + $0x1a8] ss:$16 sps:$4 sm:$0xff]  }
 0x170   :  { %2007 = vmatprep.subr.bf16.mxu0 %v2749_v17  ;;  %2089 = vmatprep.subr.bf16.mxu1 %v2752_v49  ;;  %v2836_v17 = vld [vmem:[#allocation9 + $0x1cc] ss:$16 sps:$4 sm:$0xff]   ;;  %v2831_v49 = vld [vmem:[#allocation9 + $0x1c0] ss:$16 sps:$4 sm:$0xff]  }
 0x172   :  { %1119 = vmatmul.mubr.bf16.vlgmr.msra.gmra.mrb[4].mxu0 %v253_v52  ;;  %1201 = vmatmul.mubr.bf16.vlgmr.msra.gmra.mrb[4].mxu1 %v253_v52  ;;  %v2842_v52 = vld [vmem:[#allocation9 + $0x1ec] ss:$16 sps:$4 sm:$0xff]  }
 0x173   :  { %2008 = vmatpush1.bf16.msra.mxu0 %v2747_v50  ;;  %2090 = vmatpush1.bf16.msra.mxu1 %v2750_v51  ;;  %v2834_v50 = vld [vmem:[#allocation9 + $0x1c8] ss:$16 sps:$4 sm:$0xff]   ;;  %v2839_v51 = vld [vmem:[#allocation9 + $0x1e4] ss:$16 sps:$4 sm:$0xff]  }
 0x174   :  { %2009 = vmatprep.subr.bf16.mxu0 %v2755_v30  ;;  %2091 = vmatprep.subr.bf16.mxu1 %v2758_v53  ;;  %v2837_v30 = vld [vmem:[#allocation9 + $0x1e0] ss:$16 sps:$4 sm:$0xff]   ;;  %v2840_v53 = vld [vmem:[#allocation9 + $0x1e8] ss:$16 sps:$4 sm:$0xff]  }
 0x177   :  { %2010 = vmatpush1.bf16.msra.mxu0 %v2753_v54  ;;  %2092 = vmatpush1.bf16.msra.mxu1 %v2756_v55  ;;  %v2845_v54 = vld [vmem:[#allocation9 + $0x204] ss:$16 sps:$4 sm:$0xff]   ;;  %v2848_v55 = vld [vmem:[#allocation9 + $0x20c] ss:$16 sps:$4 sm:$0xff]  }
 0x178   :  { %2011 = vmatprep.subr.bf16.mxu0 %v2761_v56  ;;  %2093 = vmatprep.subr.bf16.mxu1 %v2764_v57  ;;  %v3209_v56 = vld [vmem:[%s3255_s4] sm:$0xf] }
 0x179   :  { %v388_v57 = vrot.slane %v3209_v56, %v3179_v16 }
 0x17b   :  { %2012 = vmatpush1.bf16.msra.mxu0 %v2759_v58  ;;  %2094 = vmatpush1.bf16.msra.mxu1 %v2762_v59  ;;  %v392_v58 = vrot.slane %v3209_v56, %v3187_v18  ;;  %v400_v59 = vrot.slane %v3209_v56, %v3192_v20 }
 0x17c   :  { %2013 = vmatprep.subr.bf16.mxu0 %v2767_v60  ;;  %2095 = vmatprep.subr.bf16.mxu1 %v2770_v61 }
 0x17f   :  { %2014 = vmatpush1.bf16.msra.mxu0 %v2765_v62  ;;  %2096 = vmatpush1.bf16.msra.mxu1 %v2768_v63 }
 0x180   :  { %2015 = vmatprep.subr.bf16.mxu0 %v2773_v0  ;;  %2097 = vmatprep.subr.bf16.mxu1 %v2776_v1 }
 0x183   :  { %2016 = vmatpush1.bf16.msra.mxu0 %v2771_v2  ;;  %2098 = vmatpush1.bf16.msra.mxu1 %v2774_v3 }
 0x184   :  { %2017 = vmatprep.subr.bf16.mxu0 %v2779_v4  ;;  %2099 = vmatprep.subr.bf16.mxu1 %v2782_v5 }
 0x187   :  { %2018 = vmatpush1.bf16.msra.mxu0 %v2777_v6  ;;  %2100 = vmatpush1.bf16.msra.mxu1 %v2780_v7 }
 0x188   :  { %2019 = vmatprep.subr.bf16.mxu0 %v2785_v8  ;;  %2101 = vmatprep.subr.bf16.mxu1 %v2788_v9 }
 0x18b   :  { %2020 = vmatpush1.bf16.msra.mxu0 %v2783_v10  ;;  %2102 = vmatpush1.bf16.msra.mxu1 %v2786_v11  ;;  %v2843_v11 = vld [vmem:[#allocation9 + $0x200] ss:$16 sps:$4 sm:$0xff]  }
 0x18c   :  { %2021 = vmatprep.subr.bf16.mxu0 %v2791_v12  ;;  %2103 = vmatprep.subr.bf16.mxu1 %v2794_v13  ;;  %v2846_v12 = vld [vmem:[#allocation9 + $0x208] ss:$16 sps:$4 sm:$0xff]  }
 0x18f   :  { %2022 = vmatpush1.bf16.msra.mxu0 %v2789_v19  ;;  %2104 = vmatpush1.bf16.msra.mxu1 %v2792_v21  ;;  %v2851_v19 = vld [vmem:[#allocation9 + $0x224] ss:$16 sps:$4 sm:$0xff]   ;;  %v2854_v21 = vld [vmem:[#allocation9 + $0x22c] ss:$16 sps:$4 sm:$0xff]  }
 0x190   :  { %2023 = vmatprep.subr.bf16.mxu0 %v2797_v22  ;;  %2105 = vmatprep.subr.bf16.mxu1 %v2800_v23  ;;  %v2849_v23 = vld [vmem:[#allocation9 + $0x220] ss:$16 sps:$4 sm:$0xff]  }
 0x193   :  { %2024 = vmatpush1.bf16.msra.mxu0 %v2795_v24  ;;  %2106 = vmatpush1.bf16.msra.mxu1 %v2798_v25  ;;  %v2852_v24 = vld [vmem:[#allocation9 + $0x228] ss:$16 sps:$4 sm:$0xff]   ;;  %v2857_v25 = vld [vmem:[#allocation9 + $0x244] ss:$16 sps:$4 sm:$0xff]  }
 0x194   :  { %2025 = vmatprep.subr.bf16.mxu0 %v2803_v26  ;;  %2107 = vmatprep.subr.bf16.mxu1 %v2806_v27  ;;  %v2860_v26 = vld [vmem:[#allocation9 + $0x24c] ss:$16 sps:$4 sm:$0xff]   ;;  %v2855_v27 = vld [vmem:[#allocation9 + $0x240] ss:$16 sps:$4 sm:$0xff]  }
 0x197   :  { %2026 = vmatpush1.bf16.msra.mxu0 %v2801_v28  ;;  %2108 = vmatpush1.bf16.msra.mxu1 %v2804_v29  ;;  %v2858_v28 = vld [vmem:[#allocation9 + $0x248] ss:$16 sps:$4 sm:$0xff]   ;;  %v2863_v29 = vld [vmem:[#allocation9 + $0x264] ss:$16 sps:$4 sm:$0xff]  }
 0x198   :  { %2027 = vmatprep.subr.bf16.mxu0 %v2809_v31  ;;  %2109 = vmatprep.subr.bf16.mxu1 %v2812_v32  ;;  %v2866_v31 = vld [vmem:[#allocation9 + $0x26c] ss:$16 sps:$4 sm:$0xff]   ;;  %v2861_v32 = vld [vmem:[#allocation9 + $0x260] ss:$16 sps:$4 sm:$0xff]  }
 0x19b   :  { %2028 = vmatpush1.bf16.msra.mxu0 %v2807_v34  ;;  %2110 = vmatpush1.bf16.msra.mxu1 %v2810_v35  ;;  %v2864_v34 = vld [vmem:[#allocation9 + $0x268] ss:$16 sps:$4 sm:$0xff]   ;;  %v2869_v35 = vld [vmem:[#allocation9 + $0x284] ss:$16 sps:$4 sm:$0xff]  }
 0x19c   :  { %2029 = vmatprep.subr.bf16.mxu0 %v2815_v36  ;;  %2111 = vmatprep.subr.bf16.mxu1 %v2818_v37  ;;  %v2872_v36 = vld [vmem:[#allocation9 + $0x28c] ss:$16 sps:$4 sm:$0xff]   ;;  %v2867_v37 = vld [vmem:[#allocation9 + $0x280] ss:$16 sps:$4 sm:$0xff]  }
 0x19f   :  { %2030 = vmatpush1.bf16.msra.mxu0 %v2813_v38  ;;  %2112 = vmatpush1.bf16.msra.mxu1 %v2816_v39  ;;  %v2870_v38 = vld [vmem:[#allocation9 + $0x288] ss:$16 sps:$4 sm:$0xff]   ;;  %v2875_v39 = vld [vmem:[#allocation9 + $0x2a4] ss:$16 sps:$4 sm:$0xff]  }
 0x1a0   :  { %2031 = vmatprep.subr.bf16.mxu0 %v2821_v40  ;;  %2113 = vmatprep.subr.bf16.mxu1 %v2824_v41  ;;  %v2878_v40 = vld [vmem:[#allocation9 + $0x2ac] ss:$16 sps:$4 sm:$0xff]   ;;  %v2873_v41 = vld [vmem:[#allocation9 + $0x2a0] ss:$16 sps:$4 sm:$0xff]  }
 0x1a3   :  { %2032 = vmatpush1.bf16.msra.mxu0 %v2819_v42  ;;  %2114 = vmatpush1.bf16.msra.mxu1 %v2822_v43  ;;  %v2876_v42 = vld [vmem:[#allocation9 + $0x2a8] ss:$16 sps:$4 sm:$0xff]   ;;  %v2881_v43 = vld [vmem:[#allocation9 + $0x2c4] ss:$16 sps:$4 sm:$0xff]  }
 0x1a4   :  { %2033 = vmatprep.subr.bf16.mxu0 %v2827_v44  ;;  %2115 = vmatprep.subr.bf16.mxu1 %v2830_v45  ;;  %v2884_v44 = vld [vmem:[#allocation9 + $0x2cc] ss:$16 sps:$4 sm:$0xff]   ;;  %v2879_v45 = vld [vmem:[#allocation9 + $0x2c0] ss:$16 sps:$4 sm:$0xff]  }
 0x1a7   :  { %2034 = vmatpush1.bf16.msra.mxu0 %v2825_v46  ;;  %2116 = vmatpush1.bf16.msra.mxu1 %v2828_v47  ;;  %v2882_v46 = vld [vmem:[#allocation9 + $0x2c8] ss:$16 sps:$4 sm:$0xff]   ;;  %v2887_v47 = vld [vmem:[#allocation9 + $0x2e4] ss:$16 sps:$4 sm:$0xff]  }
 0x1a8   :  { %2035 = vmatprep.subr.bf16.mxu0 %v2833_v48  ;;  %2117 = vmatprep.subr.bf16.mxu1 %v2836_v17  ;;  %v2890_v48 = vld [vmem:[#allocation9 + $0x2ec] ss:$16 sps:$4 sm:$0xff]   ;;  %v2885_v17 = vld [vmem:[#allocation9 + $0x2e0] ss:$16 sps:$4 sm:$0xff]  }
 0x1ab   :  { %2036 = vmatpush1.bf16.msra.mxu0 %v2831_v49  ;;  %2118 = vmatpush1.bf16.msra.mxu1 %v2834_v50  ;;  %v2888_v49 = vld [vmem:[#allocation9 + $0x2e8] ss:$16 sps:$4 sm:$0xff]   ;;  %v2893_v50 = vld [vmem:[#allocation9 + $0x304] ss:$16 sps:$4 sm:$0xff]  }
 0x1ac   :  { %2037 = vmatprep.subr.bf16.mxu0 %v2839_v51  ;;  %2119 = vmatprep.subr.bf16.mxu1 %v2842_v52  ;;  %v2896_v51 = vld [vmem:[#allocation9 + $0x30c] ss:$16 sps:$4 sm:$0xff]   ;;  %v2891_v52 = vld [vmem:[#allocation9 + $0x300] ss:$16 sps:$4 sm:$0xff]  }
 0x1af   :  { %2038 = vmatpush1.bf16.msra.mxu0 %v2837_v30  ;;  %2120 = vmatpush1.bf16.msra.mxu1 %v2840_v53  ;;  %v2894_v30 = vld [vmem:[#allocation9 + $0x308] ss:$16 sps:$4 sm:$0xff]   ;;  %v2899_v53 = vld [vmem:[#allocation9 + $0x324] ss:$16 sps:$4 sm:$0xff]  }
 0x1b0   :  { %2048 = vmatprep.subr.bf16.mxu0 %v2845_v54  ;;  %2130 = vmatprep.subr.bf16.mxu1 %v2848_v55  ;;  %v2902_v54 = vld [vmem:[#allocation9 + $0x32c] ss:$16 sps:$4 sm:$0xff]   ;;  %v2897_v55 = vld [vmem:[#allocation9 + $0x320] ss:$16 sps:$4 sm:$0xff]  }
 0x245   :  { %v1120_v60 = vpop.f32.mrb[4].mxu0  ;;  %v3217_v61 = vpop.f32.mrb[4].mxu1 }
 0x246   :  { %v2510_v62 = vadd.f32 %v1120_v60, %v388_v57  ;;  %v1122_v63 = vpop.f32.mrb[5].mxu0  ;;  %v1204_v0 = vpop.f32.mrb[5].mxu1  ;;  %v2900_v57 = vld [vmem:[#allocation9 + $0x328] ss:$16 sps:$4 sm:$0xff]   ;;  %v2903_v60 = vld [vmem:[#allocation9 + $0x340] ss:$16 sps:$4 sm:$0xff]  }
 0x247   :  { %v2511_v1 = vadd.f32 %v1122_v63, %v392_v58  ;;  %v2513_v2 = vadd.f32 %v1204_v0, %v400_v59  ;;  %v1124_v3 = vpop.f32.mrb[6].mxu0  ;;  %v1206_v4 = vpop.f32.mrb[6].mxu1  ;;  %v2905_v58 = vld [vmem:[#allocation9 + $0x344] ss:$16 sps:$4 sm:$0xff]   ;;  %v2908_v59 = vld [vmem:[#allocation9 + $0x34c] ss:$16 sps:$4 sm:$0xff]  }
 0x248   :  { %v1209_v5 = vmax.f32 %v2510_v62, 0.0  ;;  %v1125_v6 = vpop.f32.mrb[7].mxu0  ;;  %v1207_v7 = vpop.f32.mrb[7].mxu1  ;;  %v2906_v62 = vld [vmem:[#allocation9 + $0x348] ss:$16 sps:$4 sm:$0xff]  }
 0x249   :  { %v1210_v8 = vmax.f32 %v2511_v1, 0.0  ;;  %v1212_v9 = vmax.f32 %v2513_v2, 0.0  ;;  %v2911_v63 = vld [vmem:[#allocation9 + $0x364] ss:$16 sps:$4 sm:$0xff]   ;;  %v2914_v0 = vld [vmem:[#allocation9 + $0x36c] ss:$16 sps:$4 sm:$0xff]  }
 0x24a   :  { %v1213_v13 = vpack.c.bf16 %v1209_v5, %v1209_v5  ;;  %v2909_v1 = vld [vmem:[#allocation9 + $0x360] ss:$16 sps:$4 sm:$0xff]   ;;  %v2912_v2 = vld [vmem:[#allocation9 + $0x368] ss:$16 sps:$4 sm:$0xff]   ;;  %v2917_v3 = vld [vmem:[#allocation9 + $0x384] ss:$16 sps:$4 sm:$0xff]  }
 0x24b   :  { %v1214_v10 = vpack.c.bf16 %v1210_v8, %v1210_v8  ;;  %v1216_v22 = vpack.c.bf16 %v1212_v9, %v1212_v9  ;;  %v2920_v4 = vld [vmem:[#allocation9 + $0x38c] ss:$16 sps:$4 sm:$0xff]   ;;  %v2915_v5 = vld [vmem:[#allocation9 + $0x380] ss:$16 sps:$4 sm:$0xff]   ;;  %v2918_v6 = vld [vmem:[#allocation9 + $0x388] ss:$16 sps:$4 sm:$0xff]  }
 0x24c   :  { %v2923_v7 = vld [vmem:[#allocation9 + $0x3a4] ss:$16 sps:$4 sm:$0xff]   ;;  %v2926_v8 = vld [vmem:[#allocation9 + $0x3ac] ss:$16 sps:$4 sm:$0xff]   ;;  %v2921_v9 = vld [vmem:[#allocation9 + $0x3a0] ss:$16 sps:$4 sm:$0xff]  }
 0x24d   :  { %2039 = vmatprep.mubr.bf16.mxu0 %v1214_v10  ;;  %2121 = vmatprep.mubr.bf16.mxu1 %v1214_v10  ;;  %v2924_v10 = vld [vmem:[#allocation9 + $0x3a8] ss:$16 sps:$4 sm:$0xff]  }
 0x24e   :  { %2040 = vmatmul.mubr.bf16.vlgmr.msra.gmra.mrb[8].mxu0 %v1213_v13  ;;  %2122 = vmatmul.mubr.bf16.vlgmr.msra.gmra.mrb[8].mxu1 %v1213_v13  ;;  %v2932_v13 = vld [vmem:[#allocation9 + $0x3cc] ss:$16 sps:$4 sm:$0xff]  }
 0x24f   :  { %2049 = vmatpush1.bf16.msra.mxu0 %v2843_v11  ;;  %2131 = vmatpush1.bf16.msra.mxu1 %v2846_v12  ;;  %v396_v11 = vrot.slane %v3209_v56, %v3201_v33  ;;  %v2929_v12 = vld [vmem:[#allocation9 + $0x3c4] ss:$16 sps:$4 sm:$0xff]  }
 0x250   :  { %2080 = vmatprep.mubr.bf16.mxu0 %v1216_v22  ;;  %2162 = vmatprep.mubr.bf16.mxu1 %v1216_v22 }
 0x251   :  { %2050 = vmatprep.subr.bf16.mxu0 %v2851_v19  ;;  %2132 = vmatprep.subr.bf16.mxu1 %v2854_v21  ;;  %v2927_v19 = vld [vmem:[#allocation9 + $0x3c0] ss:$16 sps:$4 sm:$0xff]   ;;  %v2930_v21 = vld [vmem:[#allocation9 + $0x3c8] ss:$16 sps:$4 sm:$0xff]   ;;  %v2512_v22 = vadd.f32 %v3217_v61, %v396_v11 }
 0x252   :  { %v1345_v61 = vld [vmem:[%s3257_s6] sm:$0xf]  ;;  %s3064_s6 = smov [#allocation11]  }
 0x253   :  { %2051 = vmatpush1.bf16.msra.mxu0 %v2849_v23  ;;  %2133 = vmatpush1.bf16.msra.mxu1 %v2852_v24  ;;  %v2935_v23 = vld [vmem:[#allocation9 + $0x3e4] ss:$16 sps:$4 sm:$0xff]   ;;  %v2938_v24 = vld [vmem:[#allocation9 + $0x3ec] ss:$16 sps:$4 sm:$0xff]  }
 0x254   :  { %2052 = vmatprep.subr.bf16.mxu0 %v2857_v25  ;;  %2134 = vmatprep.subr.bf16.mxu1 %v2860_v26  ;;  %v2933_v25 = vld [vmem:[#allocation9 + $0x3e0] ss:$16 sps:$4 sm:$0xff]   ;;  %v2936_v26 = vld [vmem:[#allocation9 + $0x3e8] ss:$16 sps:$4 sm:$0xff]  }
 0x257   :  { %2053 = vmatpush1.bf16.msra.mxu0 %v2855_v27  ;;  %2135 = vmatpush1.bf16.msra.mxu1 %v2858_v28  ;;  %v1211_v27 = vmax.f32 %v2512_v22, 0.0  ;;  %v1350_v28 = vrot.slane %v1345_v61, %v3179_v16 }
 0x258   :  { %2054 = vmatprep.subr.bf16.mxu0 %v2863_v29  ;;  %2136 = vmatprep.subr.bf16.mxu1 %v2866_v31  ;;  %v1358_v29 = vrot.slane %v1345_v61, %v3201_v33  ;;  %v2175_v31 = vld [vmem:[%s3258_s7] sm:$0xf]  ;;  %s2233_s7 = sshll.u32 %s3064_s6, 4  ;;  %s2234_s7 = int_to_ptr.vmem [resolvable:$true] %s2233_s7 }
 0x259   :  { %v1215_v56 = vpack.c.bf16 %v1211_v27, %v1211_v27  ;;  %s3027_s18 = scalar_lea.vmem %s2234_s7, 16  ;;  %s3031_s19 = scalar_lea.vmem %s2234_s7, 32 }
 0x25a   :  { %p3028_p4 = scmp.ne.s32.totalorder %s2234_s7, %s3027_s18  ;;  %p3032_p5 = scmp.lt.s32.totalorder %s2234_s7, %s2234_s7 }
 0x25b   :  { %2055 = vmatpush1.bf16.msra.mxu0 %v2861_v32  ;;  %2137 = vmatpush1.bf16.msra.mxu1 %v2864_v34  ;;  %v1354_v32 = vrot.slane %v1345_v61, %v3187_v18  ;;  %v1362_v34 = vrot.slane %v1345_v61, %v3192_v20  ;;  %p3033_p6 = scmp.lt.s32.totalorder %s3031_s19, %s3027_s18 }
 0x25c   :  { %2056 = vmatprep.subr.bf16.mxu0 %v2869_v35  ;;  %2138 = vmatprep.subr.bf16.mxu1 %v2872_v36 }
 0x25d   :  { %p3034_p7 = por %p3033_p6, %p3032_p5 }
 0x25f   :  { %2057 = vmatpush1.bf16.msra.mxu0 %v2867_v37  ;;  %2139 = vmatpush1.bf16.msra.mxu1 %v2870_v38  ;;  %v2180_v38 = vrot.slane %v2175_v31, %v3179_v16  ;;  %p3035_p8 = pnand %p3034_p7, %p3028_p4 }
 0x260   :  { %2058 = vmatprep.subr.bf16.mxu0 %v2875_v39  ;;  %2140 = vmatprep.subr.bf16.mxu1 %v2878_v40 }
 0x263   :  { %2059 = vmatpush1.bf16.msra.mxu0 %v2873_v41  ;;  %2141 = vmatpush1.bf16.msra.mxu1 %v2876_v42 }
 0x264   :  { %2060 = vmatprep.subr.bf16.mxu0 %v2881_v43  ;;  %2142 = vmatprep.subr.bf16.mxu1 %v2884_v44  ;;  %v2184_v43 = vrot.slane %v2175_v31, %v3187_v18 }
 0x267   :  { %2061 = vmatpush1.bf16.msra.mxu0 %v2879_v45  ;;  %2143 = vmatpush1.bf16.msra.mxu1 %v2882_v46 }
 0x268   :  { %2062 = vmatprep.subr.bf16.mxu0 %v2887_v47  ;;  %2144 = vmatprep.subr.bf16.mxu1 %v2890_v48 }
 0x26b   :  { %2063 = vmatpush1.bf16.msra.mxu0 %v2885_v17  ;;  %2145 = vmatpush1.bf16.msra.mxu1 %v2888_v49 }
 0x26c   :  { %2064 = vmatprep.subr.bf16.mxu0 %v2893_v50  ;;  %2146 = vmatprep.subr.bf16.mxu1 %v2896_v51  ;;  %v2188_v50 = vrot.slane %v2175_v31, %v3201_v33 }
 0x26f   :  { %2065 = vmatpush1.bf16.msra.mxu0 %v2891_v52  ;;  %2147 = vmatpush1.bf16.msra.mxu1 %v2894_v30 }
 0x270   :  { %2066 = vmatprep.subr.bf16.mxu0 %v2899_v53  ;;  %2148 = vmatprep.subr.bf16.mxu1 %v2902_v54  ;;  %v2192_v54 = vrot.slane %v2175_v31, %v3192_v20 }
 0x273   :  { %2067 = vmatpush1.bf16.msra.mxu0 %v2897_v55  ;;  %2149 = vmatpush1.bf16.msra.mxu1 %v2900_v57 }
 0x274   :  { %2068 = vmatprep.subr.bf16.mxu0 %v2905_v58  ;;  %2150 = vmatprep.subr.bf16.mxu1 %v2908_v59 }
 0x277   :  { %2069 = vmatpush1.bf16.msra.mxu0 %v2903_v60  ;;  %2151 = vmatpush1.bf16.msra.mxu1 %v2906_v62  ;;  %v2206_v60 = vld [vmem:[#allocation2] sm:$0x1] }
 0x278   :  { %2070 = vmatprep.subr.bf16.mxu0 %v2911_v63  ;;  %2152 = vmatprep.subr.bf16.mxu1 %v2914_v0  ;;  %v2219_v63 = vand.u32 127, %v101_v14 }
 0x27a   :  { %v2222_v33 = vsub.s32 %v2219_v63, %v3176_v15 }
 0x27b   :  { %2071 = vmatpush1.bf16.msra.mxu0 %v2909_v1  ;;  %2153 = vmatpush1.bf16.msra.mxu1 %v2912_v2 }
 0x27c   :  { %2072 = vmatprep.subr.bf16.mxu0 %v2917_v3  ;;  %2154 = vmatprep.subr.bf16.mxu1 %v2920_v4 }
 0x27f   :  { %2073 = vmatpush1.bf16.msra.mxu0 %v2915_v5  ;;  %2155 = vmatpush1.bf16.msra.mxu1 %v2918_v6 }
 0x280   :  { %2074 = vmatprep.subr.bf16.mxu0 %v2923_v7  ;;  %2156 = vmatprep.subr.bf16.mxu1 %v2926_v8 }
 0x283   :  { %2075 = vmatpush1.bf16.msra.mxu0 %v2921_v9  ;;  %2157 = vmatpush1.bf16.msra.mxu1 %v2924_v10 }
 0x284   :  { %2076 = vmatprep.subr.bf16.mxu0 %v2929_v12  ;;  %2158 = vmatprep.subr.bf16.mxu1 %v2932_v13 }
 0x287   :  { %2077 = vmatpush1.bf16.msra.mxu0 %v2927_v19  ;;  %2159 = vmatpush1.bf16.msra.mxu1 %v2930_v21 }
 0x288   :  { %2078 = vmatprep.subr.bf16.mxu0 %v2935_v23  ;;  %2160 = vmatprep.subr.bf16.mxu1 %v2938_v24 }
 0x28b   :  { %2079 = vmatpush1.bf16.msra.mxu0 %v2933_v25  ;;  %2161 = vmatpush1.bf16.msra.mxu1 %v2936_v26 }
 0x28e   :  { %2081 = vmatmul.mubr.bf16.vlgmr.msra.gmra.mrb[8].mxu0 %v1215_v56  ;;  %2163 = vmatmul.mubr.bf16.vlgmr.msra.gmra.mrb[8].mxu1 %v1215_v56 }
 0x361   :  { %v2082_v35 = vpop.f32.mrb[8].mxu0  ;;  %v2164_v36 = vpop.f32.mrb[8].mxu1 }
 0x362   :  { %v2514_v37 = vadd.f32 %v2082_v35, %v1350_v28  ;;  %v2516_v39 = vadd.f32 %v2164_v36, %v1358_v29  ;;  %v2084_v40 = vpop.f32.mrb[9].mxu0  ;;  %v2166_v41 = vpop.f32.mrb[9].mxu1 }
 0x363   :  { %v2515_v42 = vadd.f32 %v2084_v40, %v1354_v32  ;;  %v2517_v44 = vadd.f32 %v2166_v41, %v1362_v34  ;;  %v2086_v45 = vpop.f32.mrb[10].mxu0  ;;  %v2168_v46 = vpop.f32.mrb[10].mxu1 }
 0x364   :  { %v2171_v47 = vmax.f32 %v2514_v37, 0.0  ;;  %v2087_v48 = vpop.f32.mrb[11].mxu0  ;;  %v2169_v17 = vpop.f32.mrb[11].mxu1  ;;  %v2173_v49 = vmax.f32 %v2516_v39, 0.0 }
 0x365   :  { %v2172_v51 = vmax.f32 %v2515_v42, 0.0  ;;  %v2174_v53 = vmax.f32 %v2517_v44, 0.0 }
 0x366   :  { %v2197_v52 = vmul.f32 %v2180_v38, %v2171_v47  ;;  %v2199_v55 = vmul.f32 %v2188_v50, %v2173_v49 }
 0x367   :  { %v2198_v30 = vmul.f32 %v2184_v43, %v2172_v51  ;;  %v2200_v58 = vmul.f32 %v2192_v54, %v2174_v53 }
 0x369   :  { %v2201_v57 = vadd.f32 %v2198_v30, %v2197_v52 }
 0x36b   :  { %v2202_v59 = vadd.f32 %v2201_v57, %v2199_v55 }
 0x36d   :  { %v2203_v18 = vadd.f32 %v2202_v59, %v2200_v58 }
 0x36f   :  { %2204 = vadd.xlane.f32.xlu0 %v2203_v18 }
 0x385   :  { %2209 = vperm.xlu0 %2542, %v2206_v60  }
 0x3fc   :  { %v2205_v62 = vpop.xlane.xlu0 %2204 }
 0x404   :  { %v2210_v0 = vpop.permute.xlu0 %2209 }
 0x405   :  { %v2215_v1 = vrot.slane %v2210_v0, %v3179_v16 }
 0x407   :  { %v2216_v2 = vadd.f32 %v2215_v1, %v2205_v62 }
 0x409   :  { %v2223_v20 = vrot.slane %v2216_v2, %v2222_v33 }
 0x40b   :  { %2226 = vst.msk [vmem:[#allocation11] sm:$0x1] %vm2225_vm1, %v2223_v20 }
 0x40c   :  { %3038 = shalt.err (!%p3035_p8)
}
 0x40d   :  { %s3039_s23 = scalar_lea.hbm %s3260_s9, 16 }
 0x40e   :  { %p3040_p9 = scmp.ne.s32.totalorder %s3260_s9, %s3039_s23  ;;  %p3043_p10 = scmp.lt.u32.totalorder %s3039_s23, %s3260_s9 }
 0x410   :  { %p3045_p11 = pnand %p3043_p10, %p3040_p9 }
 0x412   :  { %3048 = shalt.err (!%p3045_p11)
}
 0x413   :  { %2236 = dma.vmem_to_hbm [thread:$0]  %s2234_s7, 16, %s3260_s9, [#allocation5]  }
 0x414   :  { %3055 = dma.done.wait [#allocation5], 16  }
 0x415   :  { %3056 = vsyncadd [#allocation5], 4294967280 }
 0x416   :  { %2240 = vsyncpa [#allocation4], 1 }
 0x417   :  { %2241 = vsyncpa [#allocation7], 1 }
 0x418   :  { %2242 = vsyncpa [#allocation10], 1 }
 0x419   :  { %2243 = vsyncpa [#allocation5], 1 }

// kernel: tpu_custom_call.1
= control target key start
LH: loop header
LB: loop body
LE: loop exit
PB: predicated region body
PF: predicated region fallthrough
CT: control target
= control target key end

     0   :  { %s3251_s0 = inlined_call_operand.hbm [shape: f32[8,32], index: 0, kind: input, shape index: {}]   ;;  %s3252_s1 = inlined_call_operand.hbm [shape: bf16[32,512], index: 1, kind: input, shape index: {}]   ;;  %s3253_s2 = inlined_call_operand.vmem [shape: f32[1,512], index: 2, kind: input, shape index: {}]   ;;  %s3254_s3 = inlined_call_operand.hbm [shape: bf16[512,512], index: 3, kind: input, shape index: {}]   ;;  %s3255_s4 = inlined_call_operand.vmem [shape: f32[1,512], index: 4, kind: input, shape index: {}]   ;;  %s3256_s5 = inlined_call_operand.hbm [shape: bf16[512,512], index: 5, kind: input, shape index: {}]   ;;  %s3257_s6 = inlined_call_operand.vmem [shape: f32[1,512], index: 6, kind: input, shape index: {}]   ;;  %s3258_s7 = inlined_call_operand.vmem [shape: f32[1,512], index: 7, kind: input, shape index: {}]   ;;  %s3259_s8 = inlined_call_operand.<no memory space> [shape: f32[1,1], index: 8, kind: input, shape index: {}]   ;;  %s3260_s9 = inlined_call_operand.hbm [shape: f32[1,8], index: 9, kind: output, shape index: {}]  }
   0x1   :  { %v14_v0 = vstv %s3259_s8 }
   0x2   :  { %15 = vst [vmem:[#allocation2] sm:$0x1] %v14_v0 }
   0x3   :  { %16 = vsyncpa [#allocation4], 0 }
   0x4   :  { %17 = vsyncpa [#allocation7], 0 }
   0x5   :  { %18 = vsyncpa [#allocation10], 0 }
   0x6   :  { %19 = vsyncpa [#allocation5], 0  ;;  %s3057_s11 = smov [#allocation6]   ;;  %s2939_s15 = scalar_lea.hbm %s3252_s1, 1024 }
   0x7   :  { %s35_s12 = sshll.u32 %s3057_s11, 4  ;;  %p2940_p0 = scmp.ne.s32.totalorder %s3252_s1, %s2939_s15  ;;  %s36_s12 = int_to_ptr.vmem [resolvable:$true] %s35_s12 }
   0x8   :  { %p2943_p1 = scmp.lt.u32.totalorder %s2939_s15, %s3252_s1 }
   0xa   :  { %p2945_p2 = pnand %p2943_p1, %p2940_p0 }
   0xc   :  { %2948 = shalt.err (!%p2945_p2)
}
   0xd   :  { %s2949_s8 = scalar_lea.vmem %s36_s12, 1024  ;;  %p2954_p4 = scmp.lt.s32.totalorder %s36_s12, %s36_s12 }
   0xe   :  { %p2950_p3 = scmp.ne.s32.totalorder %s36_s12, %s2949_s8  ;;  %p2955_p5 = scmp.lt.s32.totalorder %s2949_s8, %s2949_s8 }
  0x10   :  { %p2956_p6 = por %p2955_p5, %p2954_p4 }
  0x12   :  { %p2957_p7 = pnand %p2956_p6, %p2950_p3 }
  0x14   :  { %2960 = shalt.err (!%p2957_p7)
}
  0x15   :  { %s3058_s20 = smov 256   ;;  %s3059_s21 = smov 16  }
  0x16   :  { %41 = dma.hbm_to_vmem [thread:$0]  %s3252_s1, 1024, %s36_s12, [#allocation7], %s3058_s20, %s3058_s20, %s3059_s21  }
  0x17   :  { %s3060_s24 = smov [#allocation3]   ;;  %s3061_s26 = smov [#allocation8]  }
  0x18   :  { %s26_s25 = sshll.u32 %s3060_s24, 4  ;;  %s49_s27 = sshll.u32 %s3061_s26, 4  ;;  %s27_s25 = int_to_ptr.vmem [resolvable:$true] %s26_s25  ;;  %s50_s27 = int_to_ptr.vmem [resolvable:$true] %s49_s27 }
  0x19   :  { %s2961_s30 = scalar_lea.hbm %s3251_s0, 128 }
  0x1a   :  { %p2962_p8 = scmp.ne.s32.totalorder %s3251_s0, %s2961_s30  ;;  %p2965_p9 = scmp.lt.u32.totalorder %s2961_s30, %s3251_s0 }
  0x1c   :  { %p2967_p10 = pnand %p2965_p9, %p2962_p8 }
  0x1e   :  { %2970 = shalt.err (!%p2967_p10)
}
  0x1f   :  { %s2971_s1 = scalar_lea.vmem %s27_s25, 128  ;;  %p2976_p12 = scmp.lt.s32.totalorder %s27_s25, %s27_s25 }
  0x20   :  { %p2972_p11 = scmp.ne.s32.totalorder %s27_s25, %s2971_s1  ;;  %p2977_p13 = scmp.lt.s32.totalorder %s2971_s1, %s2971_s1 }
  0x22   :  { %p2978_p0 = por %p2977_p13, %p2976_p12 }
  0x24   :  { %p2979_p1 = pnand %p2978_p0, %p2972_p11 }
  0x26   :  { %2982 = shalt.err (!%p2979_p1)
}
  0x27   :  { %29 = dma.hbm_to_vmem [thread:$0]  %s3251_s0, 128, %s27_s25, [#allocation4]  }
  0x28   :  { %s2983_s18 = scalar_lea.hbm %s3254_s3, 16384 }
  0x29   :  { %p2984_p2 = scmp.ne.s32.totalorder %s3254_s3, %s2983_s18  ;;  %p2987_p3 = scmp.lt.u32.totalorder %s2983_s18, %s3254_s3 }
  0x2b   :  { %p2989_p4 = pnand %p2987_p3, %p2984_p2 }
  0x2d   :  { %2992 = shalt.err (!%p2989_p4)
}
  0x2e   :  { %s2993_s24 = scalar_lea.vmem %s50_s27, 16384  ;;  %p2998_p6 = scmp.lt.s32.totalorder %s50_s27, %s50_s27 }
  0x2f   :  { %p2994_p5 = scmp.ne.s32.totalorder %s50_s27, %s2993_s24  ;;  %p2999_p7 = scmp.lt.s32.totalorder %s2993_s24, %s2993_s24 }
  0x31   :  { %p3000_p8 = por %p2999_p7, %p2998_p6 }
  0x33   :  { %p3001_p9 = pnand %p3000_p8, %p2994_p5 }
  0x35   :  { %3004 = shalt.err (!%p3001_p9)
}
  0x36   :  { %55 = dma.hbm_to_vmem [thread:$0]  %s3254_s3, 16384, %s50_s27, [#allocation7], %s3058_s20, %s3058_s20, %s3059_s21  }
  0x37   :  { %s3062_s26 = smov [#allocation9]   ;;  %s3005_s10 = scalar_lea.hbm %s3256_s5, 16384 }
  0x38   :  { %s63_s28 = sshll.u32 %s3062_s26, 4  ;;  %p3006_p10 = scmp.ne.s32.totalorder %s3256_s5, %s3005_s10  ;;  %s64_s28 = int_to_ptr.vmem [resolvable:$true] %s63_s28 }
  0x39   :  { %p3009_p11 = scmp.lt.u32.totalorder %s3005_s10, %s3256_s5 }
  0x3b   :  { %p3011_p12 = pnand %p3009_p11, %p3006_p10 }
  0x3d   :  { %3014 = shalt.err (!%p3011_p12)
}
  0x3e   :  { %s3015_s12 = scalar_lea.vmem %s64_s28, 16384  ;;  %p3020_p0 = scmp.lt.s32.totalorder %s64_s28, %s64_s28 }
  0x3f   :  { %p3016_p13 = scmp.ne.s32.totalorder %s64_s28, %s3015_s12  ;;  %p3021_p1 = scmp.lt.s32.totalorder %s3015_s12, %s3015_s12 }
  0x41   :  { %p3022_p2 = por %p3021_p1, %p3020_p0 }
  0x43   :  { %p3023_p3 = pnand %p3022_p2, %p3016_p13 }
  0x45   :  { %3026 = shalt.err (!%p3023_p3)
}
  0x46   :  { %69 = dma.hbm_to_vmem [thread:$0]  %s3256_s5, 16384, %s64_s28, [#allocation10], %s3058_s20, %s3058_s20, %s3059_s21  }
  0x47   :  { %3049 = dma.done.wait [#allocation4], 128  }
  0x48   :  { %3050 = vsyncadd [#allocation4], 4294967168 }
  0x49   :  { %3051 = dma.done.wait [#allocation7], 17408  }
  0x4a   :  { %3052 = vsyncadd [#allocation7], 4294949888 }
  0x4b   :  { %3053 = dma.done.wait [#allocation10], 16384  }
  0x4c   :  { %3054 = vsyncadd [#allocation10], 4294950912  ;;  %v3063_v1 = vmov 0   ;;  %v2543_v2 = vld [vmem:[#allocation6 + $0x4] ss:$16 sps:$4 sm:$0xff]   ;;  %v89_v6 = vld [vmem:[#allocation3] sm:$0xff] }
  0x4d   :  { %197 = vmatprep.mubr.bf16.mxu0 %v3063_v1  ;;  %238 = vmatprep.mubr.bf16.mxu1 %v3063_v1  ;;  %v2545_v3 = vld [vmem:[#allocation6] ss:$16 sps:$4 sm:$0xff]   ;;  %v2546_v4 = vld [vmem:[#allocation6 + $0x24] ss:$16 sps:$4 sm:$0xff]   ;;  %v2549_v7 = vld [vmem:[#allocation6 + $0xc] ss:$16 sps:$4 sm:$0xff]   ;;  %v90_v10 = vpack.c.bf16 %v89_v6, %v89_v6 }
  0x4e   :  { %2542 = vset.pattern.permute.xlu0 %v3063_v1  ;;  %165 = vmatprep.subr.bf16.mxu0 %v2543_v2  ;;  %v2548_v5 = vld [vmem:[#allocation6 + $0x20] ss:$16 sps:$4 sm:$0xff]   ;;  %v2551_v8 = vld [vmem:[#allocation6 + $0x8] ss:$16 sps:$4 sm:$0xff]   ;;  %v2552_v9 = vld [vmem:[#allocation6 + $0x2c] ss:$16 sps:$4 sm:$0xff]  }
  0x4f   :  { %166 = vmatpush1.bf16.msra.mxu0 %v2545_v3  ;;  %206 = vmatprep.subr.bf16.mxu1 %v2549_v7  ;;  %v2554_v11 = vld [vmem:[#allocation6 + $0x28] ss:$16 sps:$4 sm:$0xff]   ;;  %v2557_v12 = vld [vmem:[#allocation8 + $0x4] ss:$16 sps:$4 sm:$0xff]   ;;  %vm161_vm0 = vcmask 261120   ;;  %vm2225_vm1 = vcmask 57344  }
  0x50   :  { %167 = vmatprep.subr.bf16.mxu0 %v2546_v4  ;;  %207 = vmatpush1.bf16.msra.mxu1 %v2551_v8  ;;  %v2555_v13 = vld [vmem:[#allocation8] ss:$16 sps:$4 sm:$0xff]   ;;  %v2560_v14 = vld [vmem:[#allocation8 + $0xc] ss:$16 sps:$4 sm:$0xff]   ;;  %v2563_v15 = vld [vmem:[#allocation8 + $0x24] ss:$16 sps:$4 sm:$0xff]  }
  0x51   :  { %208 = vmatprep.subr.bf16.mxu1 %v2552_v9  ;;  %v2558_v16 = vld [vmem:[#allocation8 + $0x8] ss:$16 sps:$4 sm:$0xff]   ;;  %v2561_v17 = vld [vmem:[#allocation8 + $0x20] ss:$16 sps:$4 sm:$0xff]   ;;  %v2566_v18 = vld [vmem:[#allocation8 + $0x2c] ss:$16 sps:$4 sm:$0xff]  }
  0x52   :  { %v2569_v19 = vld [vmem:[#allocation8 + $0x44] ss:$16 sps:$4 sm:$0xff]   ;;  %v2564_v20 = vld [vmem:[#allocation8 + $0x28] ss:$16 sps:$4 sm:$0xff]   ;;  %v2567_v21 = vld [vmem:[#allocation8 + $0x40] ss:$16 sps:$4 sm:$0xff]  }
  0x53   :  { %168 = vmatpush1.bf16.msra.mxu0 %v2548_v5  ;;  %v2572_v22 = vld [vmem:[#allocation8 + $0x4c] ss:$16 sps:$4 sm:$0xff]   ;;  %v2575_v23 = vld [vmem:[#allocation8 + $0x64] ss:$16 sps:$4 sm:$0xff]   ;;  %v2570_v24 = vld [vmem:[#allocation8 + $0x48] ss:$16 sps:$4 sm:$0xff]  }
  0x54   :  { %1045 = vmatprep.subr.bf16.mxu0 %v2557_v12  ;;  %209 = vmatpush1.bf16.msra.mxu1 %v2554_v11  ;;  %v2573_v25 = vld [vmem:[#allocation8 + $0x60] ss:$16 sps:$4 sm:$0xff]   ;;  %v2578_v26 = vld [vmem:[#allocation8 + $0x6c] ss:$16 sps:$4 sm:$0xff]   ;;  %v2581_v27 = vld [vmem:[#allocation8 + $0x84] ss:$16 sps:$4 sm:$0xff]  }
  0x55   :  { %1127 = vmatprep.subr.bf16.mxu1 %v2560_v14  ;;  %v2576_v28 = vld [vmem:[#allocation8 + $0x68] ss:$16 sps:$4 sm:$0xff]   ;;  %v2579_v29 = vld [vmem:[#allocation8 + $0x80] ss:$16 sps:$4 sm:$0xff]   ;;  %v2584_v30 = vld [vmem:[#allocation8 + $0x8c] ss:$16 sps:$4 sm:$0xff]   ;;  %v101_v14 = vlaneseq }
  0x56   :  { %2252 = vmatmul.mubr.msk.bf16.vlgmr.msra.gmra.mrb[0].mxu0 %vm161_vm0, %v90_v10  ;;  %v2587_v31 = vld [vmem:[#allocation8 + $0xa4] ss:$16 sps:$4 sm:$0xff]   ;;  %v2582_v32 = vld [vmem:[#allocation8 + $0x88] ss:$16 sps:$4 sm:$0xff]   ;;  %v2585_v33 = vld [vmem:[#allocation8 + $0xa0] ss:$16 sps:$4 sm:$0xff]  }
  0x57   :  { %1046 = vmatpush1.bf16.msra.mxu0 %v2555_v13  ;;  %2253 = vmatmul.mubr.msk.bf16.vlgmr.msra.gmra.mrb[0].mxu1 %vm161_vm0, %v90_v10  ;;  %v2590_v34 = vld [vmem:[#allocation8 + $0xac] ss:$16 sps:$4 sm:$0xff]   ;;  %v2593_v35 = vld [vmem:[#allocation8 + $0xc4] ss:$16 sps:$4 sm:$0xff]   ;;  %v2588_v36 = vld [vmem:[#allocation8 + $0xa8] ss:$16 sps:$4 sm:$0xff]  }
  0x58   :  { %1047 = vmatprep.subr.bf16.mxu0 %v2563_v15  ;;  %1128 = vmatpush1.bf16.msra.mxu1 %v2558_v16  ;;  %v2591_v37 = vld [vmem:[#allocation8 + $0xc0] ss:$16 sps:$4 sm:$0xff]   ;;  %v2596_v38 = vld [vmem:[#allocation8 + $0xcc] ss:$16 sps:$4 sm:$0xff]   ;;  %v2599_v39 = vld [vmem:[#allocation8 + $0xe4] ss:$16 sps:$4 sm:$0xff]  }
  0x59   :  { %1129 = vmatprep.subr.bf16.mxu1 %v2566_v18  ;;  %v2594_v40 = vld [vmem:[#allocation8 + $0xc8] ss:$16 sps:$4 sm:$0xff]   ;;  %v2597_v41 = vld [vmem:[#allocation8 + $0xe0] ss:$16 sps:$4 sm:$0xff]   ;;  %v2602_v42 = vld [vmem:[#allocation8 + $0xec] ss:$16 sps:$4 sm:$0xff]  }
  0x5a   :  { %v2605_v43 = vld [vmem:[#allocation8 + $0x104] ss:$16 sps:$4 sm:$0xff]   ;;  %v2600_v44 = vld [vmem:[#allocation8 + $0xe8] ss:$16 sps:$4 sm:$0xff]   ;;  %v2603_v45 = vld [vmem:[#allocation8 + $0x100] ss:$16 sps:$4 sm:$0xff]  }
  0x5b   :  { %1048 = vmatpush1.bf16.msra.mxu0 %v2561_v17  ;;  %v2608_v46 = vld [vmem:[#allocation8 + $0x10c] ss:$16 sps:$4 sm:$0xff]   ;;  %v2611_v47 = vld [vmem:[#allocation8 + $0x124] ss:$16 sps:$4 sm:$0xff]   ;;  %v2606_v48 = vld [vmem:[#allocation8 + $0x108] ss:$16 sps:$4 sm:$0xff]  }
  0x5c   :  { %1049 = vmatprep.subr.bf16.mxu0 %v2569_v19  ;;  %1130 = vmatpush1.bf16.msra.mxu1 %v2564_v20  ;;  %v2609_v49 = vld [vmem:[#allocation8 + $0x120] ss:$16 sps:$4 sm:$0xff]   ;;  %v2614_v50 = vld [vmem:[#allocation8 + $0x12c] ss:$16 sps:$4 sm:$0xff]   ;;  %v2617_v51 = vld [vmem:[#allocation8 + $0x144] ss:$16 sps:$4 sm:$0xff]  }
  0x5d   :  { %1131 = vmatprep.subr.bf16.mxu1 %v2572_v22  ;;  %v2612_v52 = vld [vmem:[#allocation8 + $0x128] ss:$16 sps:$4 sm:$0xff]   ;;  %v2615_v53 = vld [vmem:[#allocation8 + $0x140] ss:$16 sps:$4 sm:$0xff]   ;;  %v2620_v54 = vld [vmem:[#allocation8 + $0x14c] ss:$16 sps:$4 sm:$0xff]  }
  0x5e   :  { %v2623_v55 = vld [vmem:[#allocation8 + $0x164] ss:$16 sps:$4 sm:$0xff]   ;;  %v2618_v56 = vld [vmem:[#allocation8 + $0x148] ss:$16 sps:$4 sm:$0xff]   ;;  %v2621_v57 = vld [vmem:[#allocation8 + $0x160] ss:$16 sps:$4 sm:$0xff]  }
  0x5f   :  { %1050 = vmatpush1.bf16.msra.mxu0 %v2567_v21  ;;  %v2626_v58 = vld [vmem:[#allocation8 + $0x16c] ss:$16 sps:$4 sm:$0xff]   ;;  %v2629_v59 = vld [vmem:[#allocation8 + $0x184] ss:$16 sps:$4 sm:$0xff]   ;;  %v2624_v60 = vld [vmem:[#allocation8 + $0x168] ss:$16 sps:$4 sm:$0xff]  }
  0x60   :  { %1051 = vmatprep.subr.bf16.mxu0 %v2575_v23  ;;  %1132 = vmatpush1.bf16.msra.mxu1 %v2570_v24  ;;  %v2627_v61 = vld [vmem:[#allocation8 + $0x180] ss:$16 sps:$4 sm:$0xff]   ;;  %v2632_v62 = vld [vmem:[#allocation8 + $0x18c] ss:$16 sps:$4 sm:$0xff]   ;;  %v2635_v63 = vld [vmem:[#allocation8 + $0x1a4] ss:$16 sps:$4 sm:$0xff]  }
  0x61   :  { %1133 = vmatprep.subr.bf16.mxu1 %v2578_v26  ;;  %v2630_v0 = vld [vmem:[#allocation8 + $0x188] ss:$16 sps:$4 sm:$0xff]   ;;  %v2633_v1 = vld [vmem:[#allocation8 + $0x1a0] ss:$16 sps:$4 sm:$0xff]   ;;  %v2638_v2 = vld [vmem:[#allocation8 + $0x1ac] ss:$16 sps:$4 sm:$0xff]  }
  0x62   :  { %v2636_v3 = vld [vmem:[#allocation8 + $0x1a8] ss:$16 sps:$4 sm:$0xff]   ;;  %v2641_v4 = vld [vmem:[#allocation8 + $0x1c4] ss:$16 sps:$4 sm:$0xff]   ;;  %v2644_v5 = vld [vmem:[#allocation8 + $0x1cc] ss:$16 sps:$4 sm:$0xff]  }
  0x63   :  { %1052 = vmatpush1.bf16.msra.mxu0 %v2573_v25  ;;  %v2639_v6 = vld [vmem:[#allocation8 + $0x1c0] ss:$16 sps:$4 sm:$0xff]   ;;  %v2642_v7 = vld [vmem:[#allocation8 + $0x1c8] ss:$16 sps:$4 sm:$0xff]   ;;  %v2647_v8 = vld [vmem:[#allocation8 + $0x1e4] ss:$16 sps:$4 sm:$0xff]  }
  0x64   :  { %1053 = vmatprep.subr.bf16.mxu0 %v2581_v27  ;;  %1134 = vmatpush1.bf16.msra.mxu1 %v2576_v28  ;;  %v2650_v9 = vld [vmem:[#allocation8 + $0x1ec] ss:$16 sps:$4 sm:$0xff]   ;;  %v2645_v10 = vld [vmem:[#allocation8 + $0x1e0] ss:$16 sps:$4 sm:$0xff]   ;;  %v2648_v11 = vld [vmem:[#allocation8 + $0x1e8] ss:$16 sps:$4 sm:$0xff]  }
  0x65   :  { %1135 = vmatprep.subr.bf16.mxu1 %v2584_v30  ;;  %v2653_v12 = vld [vmem:[#allocation8 + $0x204] ss:$16 sps:$4 sm:$0xff]   ;;  %v2656_v13 = vld [vmem:[#allocation8 + $0x20c] ss:$16 sps:$4 sm:$0xff]   ;;  %v3176_v15 = vshrl.u32 %v101_v14, 7 }
  0x66   :  { %v3184_v17 = vld [vmem:[%s3253_s2] sm:$0xf] }
  0x67   :  { %1054 = vmatpush1.bf16.msra.mxu0 %v2579_v29  ;;  %v3179_v16 = vsub.s32 0, %v3176_v15  ;;  %v3187_v18 = vsub.s32 1, %v3176_v15  ;;  %v3192_v20 = vsub.s32 3, %v3176_v15 }
  0x68   :  { %1055 = vmatprep.subr.bf16.mxu0 %v2587_v31  ;;  %1136 = vmatpush1.bf16.msra.mxu1 %v2582_v32 }
  0x69   :  { %1137 = vmatprep.subr.bf16.mxu1 %v2590_v34  ;;  %v104_v19 = vrot.slane %v3184_v17, %v3179_v16  ;;  %v108_v21 = vrot.slane %v3184_v17, %v3187_v18  ;;  %v116_v25 = vrot.slane %v3184_v17, %v3192_v20 }
  0x6b   :  { %1056 = vmatpush1.bf16.msra.mxu0 %v2585_v33 }
  0x6c   :  { %1057 = vmatprep.subr.bf16.mxu0 %v2593_v35  ;;  %1138 = vmatpush1.bf16.msra.mxu1 %v2588_v36  ;;  %v2651_v36 = vld [vmem:[#allocation8 + $0x200] ss:$16 sps:$4 sm:$0xff]  }
  0x6d   :  { %1139 = vmatprep.subr.bf16.mxu1 %v2596_v38 }
  0x6f   :  { %1058 = vmatpush1.bf16.msra.mxu0 %v2591_v37  ;;  %v2654_v37 = vld [vmem:[#allocation8 + $0x208] ss:$16 sps:$4 sm:$0xff]  }
  0x70   :  { %1059 = vmatprep.subr.bf16.mxu0 %v2599_v39  ;;  %1140 = vmatpush1.bf16.msra.mxu1 %v2594_v40  ;;  %v2659_v40 = vld [vmem:[#allocation8 + $0x224] ss:$16 sps:$4 sm:$0xff]  }
  0x71   :  { %1141 = vmatprep.subr.bf16.mxu1 %v2602_v42 }
  0x73   :  { %1060 = vmatpush1.bf16.msra.mxu0 %v2597_v41  ;;  %v2662_v41 = vld [vmem:[#allocation8 + $0x22c] ss:$16 sps:$4 sm:$0xff]  }
  0x74   :  { %1061 = vmatprep.subr.bf16.mxu0 %v2605_v43  ;;  %1142 = vmatpush1.bf16.msra.mxu1 %v2600_v44  ;;  %v2657_v44 = vld [vmem:[#allocation8 + $0x220] ss:$16 sps:$4 sm:$0xff]  }
  0x75   :  { %1143 = vmatprep.subr.bf16.mxu1 %v2608_v46  ;;  %v2665_v46 = vld [vmem:[#allocation8 + $0x244] ss:$16 sps:$4 sm:$0xff]  }
  0x77   :  { %1062 = vmatpush1.bf16.msra.mxu0 %v2603_v45  ;;  %v2660_v45 = vld [vmem:[#allocation8 + $0x228] ss:$16 sps:$4 sm:$0xff]  }
  0x78   :  { %1063 = vmatprep.subr.bf16.mxu0 %v2611_v47  ;;  %1144 = vmatpush1.bf16.msra.mxu1 %v2606_v48  ;;  %v2668_v47 = vld [vmem:[#allocation8 + $0x24c] ss:$16 sps:$4 sm:$0xff]   ;;  %v2663_v48 = vld [vmem:[#allocation8 + $0x240] ss:$16 sps:$4 sm:$0xff]  }
  0x79   :  { %1145 = vmatprep.subr.bf16.mxu1 %v2614_v50  ;;  %v2671_v50 = vld [vmem:[#allocation8 + $0x264] ss:$16 sps:$4 sm:$0xff]  }
  0x7b   :  { %1064 = vmatpush1.bf16.msra.mxu0 %v2609_v49  ;;  %v2666_v49 = vld [vmem:[#allocation8 + $0x248] ss:$16 sps:$4 sm:$0xff]  }
  0x7c   :  { %1065 = vmatprep.subr.bf16.mxu0 %v2617_v51  ;;  %1146 = vmatpush1.bf16.msra.mxu1 %v2612_v52  ;;  %v2674_v51 = vld [vmem:[#allocation8 + $0x26c] ss:$16 sps:$4 sm:$0xff]   ;;  %v2669_v52 = vld [vmem:[#allocation8 + $0x260] ss:$16 sps:$4 sm:$0xff]  }
  0x7d   :  { %1147 = vmatprep.subr.bf16.mxu1 %v2620_v54  ;;  %v2677_v54 = vld [vmem:[#allocation8 + $0x284] ss:$16 sps:$4 sm:$0xff]  }
  0x7f   :  { %1066 = vmatpush1.bf16.msra.mxu0 %v2615_v53  ;;  %v2672_v53 = vld [vmem:[#allocation8 + $0x268] ss:$16 sps:$4 sm:$0xff]  }
  0x80   :  { %1067 = vmatprep.subr.bf16.mxu0 %v2623_v55  ;;  %1148 = vmatpush1.bf16.msra.mxu1 %v2618_v56  ;;  %v2680_v55 = vld [vmem:[#allocation8 + $0x28c] ss:$16 sps:$4 sm:$0xff]   ;;  %v2675_v56 = vld [vmem:[#allocation8 + $0x280] ss:$16 sps:$4 sm:$0xff]  }
  0x81   :  { %1149 = vmatprep.subr.bf16.mxu1 %v2626_v58  ;;  %v2683_v58 = vld [vmem:[#allocation8 + $0x2a4] ss:$16 sps:$4 sm:$0xff]  }
  0x83   :  { %1068 = vmatpush1.bf16.msra.mxu0 %v2621_v57  ;;  %v2678_v57 = vld [vmem:[#allocation8 + $0x288] ss:$16 sps:$4 sm:$0xff]  }
  0x84   :  { %1069 = vmatprep.subr.bf16.mxu0 %v2629_v59  ;;  %1150 = vmatpush1.bf16.msra.mxu1 %v2624_v60  ;;  %v2686_v59 = vld [vmem:[#allocation8 + $0x2ac] ss:$16 sps:$4 sm:$0xff]   ;;  %v2681_v60 = vld [vmem:[#allocation8 + $0x2a0] ss:$16 sps:$4 sm:$0xff]  }
  0x85   :  { %1151 = vmatprep.subr.bf16.mxu1 %v2632_v62  ;;  %v2689_v62 = vld [vmem:[#allocation8 + $0x2c4] ss:$16 sps:$4 sm:$0xff]  }
  0x87   :  { %1070 = vmatpush1.bf16.msra.mxu0 %v2627_v61  ;;  %v2684_v61 = vld [vmem:[#allocation8 + $0x2a8] ss:$16 sps:$4 sm:$0xff]  }
  0x88   :  { %1071 = vmatprep.subr.bf16.mxu0 %v2635_v63  ;;  %1152 = vmatpush1.bf16.msra.mxu1 %v2630_v0  ;;  %v2692_v63 = vld [vmem:[#allocation8 + $0x2cc] ss:$16 sps:$4 sm:$0xff]   ;;  %v2687_v0 = vld [vmem:[#allocation8 + $0x2c0] ss:$16 sps:$4 sm:$0xff]  }
  0x89   :  { %1153 = vmatprep.subr.bf16.mxu1 %v2638_v2  ;;  %v2695_v2 = vld [vmem:[#allocation8 + $0x2e4] ss:$16 sps:$4 sm:$0xff]  }
  0x8b   :  { %1072 = vmatpush1.bf16.msra.mxu0 %v2633_v1  ;;  %v2690_v1 = vld [vmem:[#allocation8 + $0x2c8] ss:$16 sps:$4 sm:$0xff]  }
  0x8c   :  { %1154 = vmatpush1.bf16.msra.mxu1 %v2636_v3  ;;  %1073 = vmatprep.subr.bf16.mxu0 %v2641_v4  ;;  %v2698_v3 = vld [vmem:[#allocation8 + $0x2ec] ss:$16 sps:$4 sm:$0xff]   ;;  %v2693_v4 = vld [vmem:[#allocation8 + $0x2e0] ss:$16 sps:$4 sm:$0xff]  }
  0x8d   :  { %1155 = vmatprep.subr.bf16.mxu1 %v2644_v5  ;;  %v2696_v5 = vld [vmem:[#allocation8 + $0x2e8] ss:$16 sps:$4 sm:$0xff]  }
  0x8f   :  { %1074 = vmatpush1.bf16.msra.mxu0 %v2639_v6  ;;  %v2701_v6 = vld [vmem:[#allocation8 + $0x304] ss:$16 sps:$4 sm:$0xff]  }
  0x90   :  { %1156 = vmatpush1.bf16.msra.mxu1 %v2642_v7  ;;  %1075 = vmatprep.subr.bf16.mxu0 %v2647_v8  ;;  %v2704_v7 = vld [vmem:[#allocation8 + $0x30c] ss:$16 sps:$4 sm:$0xff]   ;;  %v2699_v8 = vld [vmem:[#allocation8 + $0x300] ss:$16 sps:$4 sm:$0xff]  }
  0x91   :  { %1157 = vmatprep.subr.bf16.mxu1 %v2650_v9  ;;  %v2702_v9 = vld [vmem:[#allocation8 + $0x308] ss:$16 sps:$4 sm:$0xff]  }
  0x93   :  { %1076 = vmatpush1.bf16.msra.mxu0 %v2645_v10  ;;  %v2707_v10 = vld [vmem:[#allocation8 + $0x324] ss:$16 sps:$4 sm:$0xff]  }
  0x94   :  { %1158 = vmatpush1.bf16.msra.mxu1 %v2648_v11  ;;  %1086 = vmatprep.subr.bf16.mxu0 %v2653_v12  ;;  %v2710_v11 = vld [vmem:[#allocation8 + $0x32c] ss:$16 sps:$4 sm:$0xff]   ;;  %v2705_v12 = vld [vmem:[#allocation8 + $0x320] ss:$16 sps:$4 sm:$0xff]  }
  0x95   :  { %1168 = vmatprep.subr.bf16.mxu1 %v2656_v13  ;;  %v2708_v13 = vld [vmem:[#allocation8 + $0x328] ss:$16 sps:$4 sm:$0xff]  }
 0x129   :  { %v199_v22 = vpop.f32.mrb[0].mxu0 }
 0x12a   :  { %v200_v23 = vadd.f32 %v199_v22, %v104_v19  ;;  %v201_v24 = vpop.f32.mrb[1].mxu0  ;;  %v3198_v30 = vpop.f32.mrb[0].mxu1  ;;  %v2713_v19 = vld [vmem:[#allocation8 + $0x344] ss:$16 sps:$4 sm:$0xff]   ;;  %v2711_v22 = vld [vmem:[#allocation8 + $0x340] ss:$16 sps:$4 sm:$0xff]  }
 0x12b   :  { %v202_v26 = vadd.f32 %v201_v24, %v108_v21  ;;  %v203_v27 = vpop.f32.mrb[2].mxu0  ;;  %v242_v32 = vpop.f32.mrb[1].mxu1  ;;  %v2716_v21 = vld [vmem:[#allocation8 + $0x34c] ss:$16 sps:$4 sm:$0xff]   ;;  %v2719_v24 = vld [vmem:[#allocation8 + $0x364] ss:$16 sps:$4 sm:$0xff]  }
 0x12c   :  { %v247_v28 = vmax.f32 %v200_v23, 0.0  ;;  %v204_v29 = vpop.f32.mrb[3].mxu0  ;;  %v243_v33 = vadd.f32 %v242_v32, %v116_v25  ;;  %v244_v34 = vpop.f32.mrb[2].mxu1  ;;  %v2714_v23 = vld [vmem:[#allocation8 + $0x348] ss:$16 sps:$4 sm:$0xff]  }
 0x12d   :  { %v248_v31 = vmax.f32 %v202_v26, 0.0  ;;  %v245_v38 = vpop.f32.mrb[3].mxu1  ;;  %v2722_v25 = vld [vmem:[#allocation8 + $0x36c] ss:$16 sps:$4 sm:$0xff]   ;;  %v2717_v26 = vld [vmem:[#allocation8 + $0x360] ss:$16 sps:$4 sm:$0xff]  }
 0x12e   :  { %v251_v39 = vpack.c.bf16 %v247_v28, %v247_v28  ;;  %v250_v42 = vmax.f32 %v243_v33, 0.0  ;;  %v2720_v27 = vld [vmem:[#allocation8 + $0x368] ss:$16 sps:$4 sm:$0xff]   ;;  %v2725_v28 = vld [vmem:[#allocation8 + $0x384] ss:$16 sps:$4 sm:$0xff]   ;;  %v3201_v33 = vsub.s32 2, %v3176_v15 }
 0x12f   :  { %v252_v35 = vpack.c.bf16 %v248_v31, %v248_v31  ;;  %v2728_v29 = vld [vmem:[#allocation8 + $0x38c] ss:$16 sps:$4 sm:$0xff]   ;;  %v2723_v31 = vld [vmem:[#allocation8 + $0x380] ss:$16 sps:$4 sm:$0xff]   ;;  %v2726_v32 = vld [vmem:[#allocation8 + $0x388] ss:$16 sps:$4 sm:$0xff]  }
 0x130   :  { %v254_v43 = vpack.c.bf16 %v250_v42, %v250_v42  ;;  %v2731_v34 = vld [vmem:[#allocation8 + $0x3a4] ss:$16 sps:$4 sm:$0xff]   ;;  %v112_v38 = vrot.slane %v3184_v17, %v3201_v33  ;;  %v2738_v42 = vld [vmem:[#allocation8 + $0x3c8] ss:$16 sps:$4 sm:$0xff]  }
 0x131   :  { %1077 = vmatprep.mubr.bf16.mxu0 %v252_v35  ;;  %1159 = vmatprep.mubr.bf16.mxu1 %v252_v35  ;;  %v2734_v35 = vld [vmem:[#allocation8 + $0x3ac] ss:$16 sps:$4 sm:$0xff]   ;;  %v2749_v17 = vld [vmem:[#allocation9 + $0x4] ss:$16 sps:$4 sm:$0xff]  }
 0x132   :  { %1078 = vmatmul.mubr.bf16.vlgmr.msra.gmra.mrb[4].mxu0 %v251_v39  ;;  %1160 = vmatmul.mubr.bf16.vlgmr.msra.gmra.mrb[4].mxu1 %v251_v39  ;;  %v2737_v39 = vld [vmem:[#allocation8 + $0x3c4] ss:$16 sps:$4 sm:$0xff]  }
 0x133   :  { %1087 = vmatpush1.bf16.msra.mxu0 %v2651_v36  ;;  %1169 = vmatpush1.bf16.msra.mxu1 %v2654_v37  ;;  %v2729_v36 = vld [vmem:[#allocation8 + $0x3a0] ss:$16 sps:$4 sm:$0xff]   ;;  %v2732_v37 = vld [vmem:[#allocation8 + $0x3a8] ss:$16 sps:$4 sm:$0xff]  }
 0x134   :  { %1088 = vmatprep.subr.bf16.mxu0 %v2659_v40  ;;  %1170 = vmatprep.subr.bf16.mxu1 %v2662_v41  ;;  %v2740_v40 = vld [vmem:[#allocation8 + $0x3cc] ss:$16 sps:$4 sm:$0xff]   ;;  %v2735_v41 = vld [vmem:[#allocation8 + $0x3c0] ss:$16 sps:$4 sm:$0xff]  }
 0x135   :  { %1118 = vmatprep.mubr.bf16.mxu0 %v254_v43  ;;  %1200 = vmatprep.mubr.bf16.mxu1 %v254_v43  ;;  %v241_v43 = vadd.f32 %v3198_v30, %v112_v38  ;;  %v2755_v30 = vld [vmem:[#allocation9 + $0x24] ss:$16 sps:$4 sm:$0xff]   ;;  %v2813_v38 = vld [vmem:[#allocation9 + $0x160] ss:$16 sps:$4 sm:$0xff]  }
 0x137   :  { %1089 = vmatpush1.bf16.msra.mxu0 %v2657_v44  ;;  %1171 = vmatpush1.bf16.msra.mxu1 %v2660_v45  ;;  %v2743_v44 = vld [vmem:[#allocation8 + $0x3e4] ss:$16 sps:$4 sm:$0xff]   ;;  %v2746_v45 = vld [vmem:[#allocation8 + $0x3ec] ss:$16 sps:$4 sm:$0xff]  }
 0x138   :  { %1090 = vmatprep.subr.bf16.mxu0 %v2665_v46  ;;  %1172 = vmatprep.subr.bf16.mxu1 %v2668_v47  ;;  %v2741_v46 = vld [vmem:[#allocation8 + $0x3e0] ss:$16 sps:$4 sm:$0xff]   ;;  %v2744_v47 = vld [vmem:[#allocation8 + $0x3e8] ss:$16 sps:$4 sm:$0xff]  }
 0x13b   :  { %1091 = vmatpush1.bf16.msra.mxu0 %v2663_v48  ;;  %1173 = vmatpush1.bf16.msra.mxu1 %v2666_v49  ;;  %v249_v48 = vmax.f32 %v241_v43, 0.0  ;;  %v2752_v49 = vld [vmem:[#allocation9 + $0xc] ss:$16 sps:$4 sm:$0xff]   ;;  %v2822_v43 = vld [vmem:[#allocation9 + $0x188] ss:$16 sps:$4 sm:$0xff]  }
 0x13c   :  { %1092 = vmatprep.subr.bf16.mxu0 %v2671_v50  ;;  %1174 = vmatprep.subr.bf16.mxu1 %v2674_v51  ;;  %v2747_v50 = vld [vmem:[#allocation9] ss:$16 sps:$4 sm:$0xff]   ;;  %v2750_v51 = vld [vmem:[#allocation9 + $0x8] ss:$16 sps:$4 sm:$0xff]  }
 0x13f   :  { %1093 = vmatpush1.bf16.msra.mxu0 %v2669_v52  ;;  %1175 = vmatpush1.bf16.msra.mxu1 %v2672_v53  ;;  %v253_v52 = vpack.c.bf16 %v249_v48, %v249_v48  ;;  %v2758_v53 = vld [vmem:[#allocation9 + $0x2c] ss:$16 sps:$4 sm:$0xff]   ;;  %v2833_v48 = vld [vmem:[#allocation9 + $0x1c4] ss:$16 sps:$4 sm:$0xff]  }
 0x140   :  { %1094 = vmatprep.subr.bf16.mxu0 %v2677_v54  ;;  %1176 = vmatprep.subr.bf16.mxu1 %v2680_v55  ;;  %v2753_v54 = vld [vmem:[#allocation9 + $0x20] ss:$16 sps:$4 sm:$0xff]   ;;  %v2756_v55 = vld [vmem:[#allocation9 + $0x28] ss:$16 sps:$4 sm:$0xff]  }
 0x143   :  { %1095 = vmatpush1.bf16.msra.mxu0 %v2675_v56  ;;  %1177 = vmatpush1.bf16.msra.mxu1 %v2678_v57  ;;  %v2761_v56 = vld [vmem:[#allocation9 + $0x44] ss:$16 sps:$4 sm:$0xff]   ;;  %v2764_v57 = vld [vmem:[#allocation9 + $0x4c] ss:$16 sps:$4 sm:$0xff]  }
 0x144   :  { %1096 = vmatprep.subr.bf16.mxu0 %v2683_v58  ;;  %1178 = vmatprep.subr.bf16.mxu1 %v2686_v59  ;;  %v2759_v58 = vld [vmem:[#allocation9 + $0x40] ss:$16 sps:$4 sm:$0xff]   ;;  %v2762_v59 = vld [vmem:[#allocation9 + $0x48] ss:$16 sps:$4 sm:$0xff]  }
 0x147   :  { %1097 = vmatpush1.bf16.msra.mxu0 %v2681_v60  ;;  %1179 = vmatpush1.bf16.msra.mxu1 %v2684_v61  ;;  %v2767_v60 = vld [vmem:[#allocation9 + $0x64] ss:$16 sps:$4 sm:$0xff]   ;;  %v2770_v61 = vld [vmem:[#allocation9 + $0x6c] ss:$16 sps:$4 sm:$0xff]  }
 0x148   :  { %1098 = vmatprep.subr.bf16.mxu0 %v2689_v62  ;;  %1180 = vmatprep.subr.bf16.mxu1 %v2692_v63  ;;  %v2765_v62 = vld [vmem:[#allocation9 + $0x60] ss:$16 sps:$4 sm:$0xff]   ;;  %v2768_v63 = vld [vmem:[#allocation9 + $0x68] ss:$16 sps:$4 sm:$0xff]  }
 0x14b   :  { %1099 = vmatpush1.bf16.msra.mxu0 %v2687_v0  ;;  %1181 = vmatpush1.bf16.msra.mxu1 %v2690_v1  ;;  %v2773_v0 = vld [vmem:[#allocation9 + $0x84] ss:$16 sps:$4 sm:$0xff]   ;;  %v2776_v1 = vld [vmem:[#allocation9 + $0x8c] ss:$16 sps:$4 sm:$0xff]  }
 0x14c   :  { %1100 = vmatprep.subr.bf16.mxu0 %v2695_v2  ;;  %1182 = vmatprep.subr.bf16.mxu1 %v2698_v3  ;;  %v2771_v2 = vld [vmem:[#allocation9 + $0x80] ss:$16 sps:$4 sm:$0xff]   ;;  %v2774_v3 = vld [vmem:[#allocation9 + $0x88] ss:$16 sps:$4 sm:$0xff]  }
 0x14f   :  { %1101 = vmatpush1.bf16.msra.mxu0 %v2693_v4  ;;  %1183 = vmatpush1.bf16.msra.mxu1 %v2696_v5  ;;  %v2779_v4 = vld [vmem:[#allocation9 + $0xa4] ss:$16 sps:$4 sm:$0xff]   ;;  %v2782_v5 = vld [vmem:[#allocation9 + $0xac] ss:$16 sps:$4 sm:$0xff]  }
 0x150   :  { %1102 = vmatprep.subr.bf16.mxu0 %v2701_v6  ;;  %1184 = vmatprep.subr.bf16.mxu1 %v2704_v7  ;;  %v2777_v6 = vld [vmem:[#allocation9 + $0xa0] ss:$16 sps:$4 sm:$0xff]   ;;  %v2780_v7 = vld [vmem:[#allocation9 + $0xa8] ss:$16 sps:$4 sm:$0xff]  }
 0x153   :  { %1103 = vmatpush1.bf16.msra.mxu0 %v2699_v8  ;;  %1185 = vmatpush1.bf16.msra.mxu1 %v2702_v9  ;;  %v2785_v8 = vld [vmem:[#allocation9 + $0xc4] ss:$16 sps:$4 sm:$0xff]   ;;  %v2788_v9 = vld [vmem:[#allocation9 + $0xcc] ss:$16 sps:$4 sm:$0xff]  }
 0x154   :  { %1104 = vmatprep.subr.bf16.mxu0 %v2707_v10  ;;  %1186 = vmatprep.subr.bf16.mxu1 %v2710_v11  ;;  %v2783_v10 = vld [vmem:[#allocation9 + $0xc0] ss:$16 sps:$4 sm:$0xff]   ;;  %v2786_v11 = vld [vmem:[#allocation9 + $0xc8] ss:$16 sps:$4 sm:$0xff]  }
 0x157   :  { %1105 = vmatpush1.bf16.msra.mxu0 %v2705_v12  ;;  %1187 = vmatpush1.bf16.msra.mxu1 %v2708_v13  ;;  %v2791_v12 = vld [vmem:[#allocation9 + $0xe4] ss:$16 sps:$4 sm:$0xff]   ;;  %v2794_v13 = vld [vmem:[#allocation9 + $0xec] ss:$16 sps:$4 sm:$0xff]  }
 0x158   :  { %1106 = vmatprep.subr.bf16.mxu0 %v2713_v19  ;;  %1188 = vmatprep.subr.bf16.mxu1 %v2716_v21  ;;  %v2789_v19 = vld [vmem:[#allocation9 + $0xe0] ss:$16 sps:$4 sm:$0xff]   ;;  %v2792_v21 = vld [vmem:[#allocation9 + $0xe8] ss:$16 sps:$4 sm:$0xff]  }
 0x15b   :  { %1107 = vmatpush1.bf16.msra.mxu0 %v2711_v22  ;;  %1189 = vmatpush1.bf16.msra.mxu1 %v2714_v23  ;;  %v2797_v22 = vld [vmem:[#allocation9 + $0x104] ss:$16 sps:$4 sm:$0xff]   ;;  %v2800_v23 = vld [vmem:[#allocation9 + $0x10c] ss:$16 sps:$4 sm:$0xff]  }
 0x15c   :  { %1108 = vmatprep.subr.bf16.mxu0 %v2719_v24  ;;  %1190 = vmatprep.subr.bf16.mxu1 %v2722_v25  ;;  %v2795_v24 = vld [vmem:[#allocation9 + $0x100] ss:$16 sps:$4 sm:$0xff]   ;;  %v2798_v25 = vld [vmem:[#allocation9 + $0x108] ss:$16 sps:$4 sm:$0xff]  }
 0x15f   :  { %1109 = vmatpush1.bf16.msra.mxu0 %v2717_v26  ;;  %1191 = vmatpush1.bf16.msra.mxu1 %v2720_v27  ;;  %v2803_v26 = vld [vmem:[#allocation9 + $0x124] ss:$16 sps:$4 sm:$0xff]   ;;  %v2806_v27 = vld [vmem:[#allocation9 + $0x12c] ss:$16 sps:$4 sm:$0xff]  }
 0x160   :  { %1110 = vmatprep.subr.bf16.mxu0 %v2725_v28  ;;  %1192 = vmatprep.subr.bf16.mxu1 %v2728_v29  ;;  %v2801_v28 = vld [vmem:[#allocation9 + $0x120] ss:$16 sps:$4 sm:$0xff]   ;;  %v2804_v29 = vld [vmem:[#allocation9 + $0x128] ss:$16 sps:$4 sm:$0xff]  }
 0x163   :  { %1111 = vmatpush1.bf16.msra.mxu0 %v2723_v31  ;;  %1193 = vmatpush1.bf16.msra.mxu1 %v2726_v32  ;;  %v2809_v31 = vld [vmem:[#allocation9 + $0x144] ss:$16 sps:$4 sm:$0xff]   ;;  %v2812_v32 = vld [vmem:[#allocation9 + $0x14c] ss:$16 sps:$4 sm:$0xff]  }
 0x164   :  { %1112 = vmatprep.subr.bf16.mxu0 %v2731_v34  ;;  %1194 = vmatprep.subr.bf16.mxu1 %v2734_v35  ;;  %v2807_v34 = vld [vmem:[#allocation9 + $0x140] ss:$16 sps:$4 sm:$0xff]   ;;  %v2810_v35 = vld [vmem:[#allocation9 + $0x148] ss:$16 sps:$4 sm:$0xff]  }
 0x167   :  { %1113 = vmatpush1.bf16.msra.mxu0 %v2729_v36  ;;  %1195 = vmatpush1.bf16.msra.mxu1 %v2732_v37  ;;  %v2815_v36 = vld [vmem:[#allocation9 + $0x164] ss:$16 sps:$4 sm:$0xff]   ;;  %v2818_v37 = vld [vmem:[#allocation9 + $0x16c] ss:$16 sps:$4 sm:$0xff]  }
 0x168   :  { %1114 = vmatprep.subr.bf16.mxu0 %v2737_v39  ;;  %1196 = vmatprep.subr.bf16.mxu1 %v2740_v40  ;;  %v2816_v39 = vld [vmem:[#allocation9 + $0x168] ss:$16 sps:$4 sm:$0xff]   ;;  %v2821_v40 = vld [vmem:[#allocation9 + $0x184] ss:$16 sps:$4 sm:$0xff]  }
 0x16b   :  { %1115 = vmatpush1.bf16.msra.mxu0 %v2735_v41  ;;  %1197 = vmatpush1.bf16.msra.mxu1 %v2738_v42  ;;  %v2824_v41 = vld [vmem:[#allocation9 + $0x18c] ss:$16 sps:$4 sm:$0xff]   ;;  %v2819_v42 = vld [vmem:[#allocation9 + $0x180] ss:$16 sps:$4 sm:$0xff]  }
 0x16c   :  { %1116 = vmatprep.subr.bf16.mxu0 %v2743_v44  ;;  %1198 = vmatprep.subr.bf16.mxu1 %v2746_v45  ;;  %v2827_v44 = vld [vmem:[#allocation9 + $0x1a4] ss:$16 sps:$4 sm:$0xff]   ;;  %v2830_v45 = vld [vmem:[#allocation9 + $0x1ac] ss:$16 sps:$4 sm:$0xff]  }
 0x16f   :  { %1117 = vmatpush1.bf16.msra.mxu0 %v2741_v46  ;;  %1199 = vmatpush1.bf16.msra.mxu1 %v2744_v47  ;;  %v2825_v46 = vld [vmem:[#allocation9 + $0x1a0] ss:$16 sps:$4 sm:$0xff]   ;;  %v2828_v47 = vld [vmem:[#allocation9 + $0x1a8] ss:$16 sps:$4 sm:$0xff]  }
 0x170   :  { %2007 = vmatprep.subr.bf16.mxu0 %v2749_v17  ;;  %2089 = vmatprep.subr.bf16.mxu1 %v2752_v49  ;;  %v2836_v17 = vld [vmem:[#allocation9 + $0x1cc] ss:$16 sps:$4 sm:$0xff]   ;;  %v2831_v49 = vld [vmem:[#allocation9 + $0x1c0] ss:$16 sps:$4 sm:$0xff]  }
 0x172   :  { %1119 = vmatmul.mubr.bf16.vlgmr.msra.gmra.mrb[4].mxu0 %v253_v52  ;;  %1201 = vmatmul.mubr.bf16.vlgmr.msra.gmra.mrb[4].mxu1 %v253_v52  ;;  %v2842_v52 = vld [vmem:[#allocation9 + $0x1ec] ss:$16 sps:$4 sm:$0xff]  }
 0x173   :  { %2008 = vmatpush1.bf16.msra.mxu0 %v2747_v50  ;;  %2090 = vmatpush1.bf16.msra.mxu1 %v2750_v51  ;;  %v2834_v50 = vld [vmem:[#allocation9 + $0x1c8] ss:$16 sps:$4 sm:$0xff]   ;;  %v2839_v51 = vld [vmem:[#allocation9 + $0x1e4] ss:$16 sps:$4 sm:$0xff]  }
 0x174   :  { %2009 = vmatprep.subr.bf16.mxu0 %v2755_v30  ;;  %2091 = vmatprep.subr.bf16.mxu1 %v2758_v53  ;;  %v2837_v30 = vld [vmem:[#allocation9 + $0x1e0] ss:$16 sps:$4 sm:$0xff]   ;;  %v2840_v53 = vld [vmem:[#allocation9 + $0x1e8] ss:$16 sps:$4 sm:$0xff]  }
 0x177   :  { %2010 = vmatpush1.bf16.msra.mxu0 %v2753_v54  ;;  %2092 = vmatpush1.bf16.msra.mxu1 %v2756_v55  ;;  %v2845_v54 = vld [vmem:[#allocation9 + $0x204] ss:$16 sps:$4 sm:$0xff]   ;;  %v2848_v55 = vld [vmem:[#allocation9 + $0x20c] ss:$16 sps:$4 sm:$0xff]  }
 0x178   :  { %2011 = vmatprep.subr.bf16.mxu0 %v2761_v56  ;;  %2093 = vmatprep.subr.bf16.mxu1 %v2764_v57  ;;  %v3209_v56 = vld [vmem:[%s3255_s4] sm:$0xf] }
 0x179   :  { %v388_v57 = vrot.slane %v3209_v56, %v3179_v16 }
 0x17b   :  { %2012 = vmatpush1.bf16.msra.mxu0 %v2759_v58  ;;  %2094 = vmatpush1.bf16.msra.mxu1 %v2762_v59  ;;  %v392_v58 = vrot.slane %v3209_v56, %v3187_v18  ;;  %v400_v59 = vrot.slane %v3209_v56, %v3192_v20 }
 0x17c   :  { %2013 = vmatprep.subr.bf16.mxu0 %v2767_v60  ;;  %2095 = vmatprep.subr.bf16.mxu1 %v2770_v61 }
 0x17f   :  { %2014 = vmatpush1.bf16.msra.mxu0 %v2765_v62  ;;  %2096 = vmatpush1.bf16.msra.mxu1 %v2768_v63 }
 0x180   :  { %2015 = vmatprep.subr.bf16.mxu0 %v2773_v0  ;;  %2097 = vmatprep.subr.bf16.mxu1 %v2776_v1 }
 0x183   :  { %2016 = vmatpush1.bf16.msra.mxu0 %v2771_v2  ;;  %2098 = vmatpush1.bf16.msra.mxu1 %v2774_v3 }
 0x184   :  { %2017 = vmatprep.subr.bf16.mxu0 %v2779_v4  ;;  %2099 = vmatprep.subr.bf16.mxu1 %v2782_v5 }
 0x187   :  { %2018 = vmatpush1.bf16.msra.mxu0 %v2777_v6  ;;  %2100 = vmatpush1.bf16.msra.mxu1 %v2780_v7 }
 0x188   :  { %2019 = vmatprep.subr.bf16.mxu0 %v2785_v8  ;;  %2101 = vmatprep.subr.bf16.mxu1 %v2788_v9 }
 0x18b   :  { %2020 = vmatpush1.bf16.msra.mxu0 %v2783_v10  ;;  %2102 = vmatpush1.bf16.msra.mxu1 %v2786_v11  ;;  %v2843_v11 = vld [vmem:[#allocation9 + $0x200] ss:$16 sps:$4 sm:$0xff]  }
 0x18c   :  { %2021 = vmatprep.subr.bf16.mxu0 %v2791_v12  ;;  %2103 = vmatprep.subr.bf16.mxu1 %v2794_v13  ;;  %v2846_v12 = vld [vmem:[#allocation9 + $0x208] ss:$16 sps:$4 sm:$0xff]  }
 0x18f   :  { %2022 = vmatpush1.bf16.msra.mxu0 %v2789_v19  ;;  %2104 = vmatpush1.bf16.msra.mxu1 %v2792_v21  ;;  %v2851_v19 = vld [vmem:[#allocation9 + $0x224] ss:$16 sps:$4 sm:$0xff]   ;;  %v2854_v21 = vld [vmem:[#allocation9 + $0x22c] ss:$16 sps:$4 sm:$0xff]  }
 0x190   :  { %2023 = vmatprep.subr.bf16.mxu0 %v2797_v22  ;;  %2105 = vmatprep.subr.bf16.mxu1 %v2800_v23  ;;  %v2849_v23 = vld [vmem:[#allocation9 + $0x220] ss:$16 sps:$4 sm:$0xff]  }
 0x193   :  { %2024 = vmatpush1.bf16.msra.mxu0 %v2795_v24  ;;  %2106 = vmatpush1.bf16.msra.mxu1 %v2798_v25  ;;  %v2852_v24 = vld [vmem:[#allocation9 + $0x228] ss:$16 sps:$4 sm:$0xff]   ;;  %v2857_v25 = vld [vmem:[#allocation9 + $0x244] ss:$16 sps:$4 sm:$0xff]  }
 0x194   :  { %2025 = vmatprep.subr.bf16.mxu0 %v2803_v26  ;;  %2107 = vmatprep.subr.bf16.mxu1 %v2806_v27  ;;  %v2860_v26 = vld [vmem:[#allocation9 + $0x24c] ss:$16 sps:$4 sm:$0xff]   ;;  %v2855_v27 = vld [vmem:[#allocation9 + $0x240] ss:$16 sps:$4 sm:$0xff]  }
 0x197   :  { %2026 = vmatpush1.bf16.msra.mxu0 %v2801_v28  ;;  %2108 = vmatpush1.bf16.msra.mxu1 %v2804_v29  ;;  %v2858_v28 = vld [vmem:[#allocation9 + $0x248] ss:$16 sps:$4 sm:$0xff]   ;;  %v2863_v29 = vld [vmem:[#allocation9 + $0x264] ss:$16 sps:$4 sm:$0xff]  }
 0x198   :  { %2027 = vmatprep.subr.bf16.mxu0 %v2809_v31  ;;  %2109 = vmatprep.subr.bf16.mxu1 %v2812_v32  ;;  %v2866_v31 = vld [vmem:[#allocation9 + $0x26c] ss:$16 sps:$4 sm:$0xff]   ;;  %v2861_v32 = vld [vmem:[#allocation9 + $0x260] ss:$16 sps:$4 sm:$0xff]  }
 0x19b   :  { %2028 = vmatpush1.bf16.msra.mxu0 %v2807_v34  ;;  %2110 = vmatpush1.bf16.msra.mxu1 %v2810_v35  ;;  %v2864_v34 = vld [vmem:[#allocation9 + $0x268] ss:$16 sps:$4 sm:$0xff]   ;;  %v2869_v35 = vld [vmem:[#allocation9 + $0x284] ss:$16 sps:$4 sm:$0xff]  }
 0x19c   :  { %2029 = vmatprep.subr.bf16.mxu0 %v2815_v36  ;;  %2111 = vmatprep.subr.bf16.mxu1 %v2818_v37  ;;  %v2872_v36 = vld [vmem:[#allocation9 + $0x28c] ss:$16 sps:$4 sm:$0xff]   ;;  %v2867_v37 = vld [vmem:[#allocation9 + $0x280] ss:$16 sps:$4 sm:$0xff]  }
 0x19f   :  { %2030 = vmatpush1.bf16.msra.mxu0 %v2813_v38  ;;  %2112 = vmatpush1.bf16.msra.mxu1 %v2816_v39  ;;  %v2870_v38 = vld [vmem:[#allocation9 + $0x288] ss:$16 sps:$4 sm:$0xff]   ;;  %v2875_v39 = vld [vmem:[#allocation9 + $0x2a4] ss:$16 sps:$4 sm:$0xff]  }
 0x1a0   :  { %2031 = vmatprep.subr.bf16.mxu0 %v2821_v40  ;;  %2113 = vmatprep.subr.bf16.mxu1 %v2824_v41  ;;  %v2878_v40 = vld [vmem:[#allocation9 + $0x2ac] ss:$16 sps:$4 sm:$0xff]   ;;  %v2873_v41 = vld [vmem:[#allocation9 + $0x2a0] ss:$16 sps:$4 sm:$0xff]  }
 0x1a3   :  { %2032 = vmatpush1.bf16.msra.mxu0 %v2819_v42  ;;  %2114 = vmatpush1.bf16.msra.mxu1 %v2822_v43  ;;  %v2876_v42 = vld [vmem:[#allocation9 + $0x2a8] ss:$16 sps:$4 sm:$0xff]   ;;  %v2881_v43 = vld [vmem:[#allocation9 + $0x2c4] ss:$16 sps:$4 sm:$0xff]  }
 0x1a4   :  { %2033 = vmatprep.subr.bf16.mxu0 %v2827_v44  ;;  %2115 = vmatprep.subr.bf16.mxu1 %v2830_v45  ;;  %v2884_v44 = vld [vmem:[#allocation9 + $0x2cc] ss:$16 sps:$4 sm:$0xff]   ;;  %v2879_v45 = vld [vmem:[#allocation9 + $0x2c0] ss:$16 sps:$4 sm:$0xff]  }
 0x1a7   :  { %2034 = vmatpush1.bf16.msra.mxu0 %v2825_v46  ;;  %2116 = vmatpush1.bf16.msra.mxu1 %v2828_v47  ;;  %v2882_v46 = vld [vmem:[#allocation9 + $0x2c8] ss:$16 sps:$4 sm:$0xff]   ;;  %v2887_v47 = vld [vmem:[#allocation9 + $0x2e4] ss:$16 sps:$4 sm:$0xff]  }
 0x1a8   :  { %2035 = vmatprep.subr.bf16.mxu0 %v2833_v48  ;;  %2117 = vmatprep.subr.bf16.mxu1 %v2836_v17  ;;  %v2890_v48 = vld [vmem:[#allocation9 + $0x2ec] ss:$16 sps:$4 sm:$0xff]   ;;  %v2885_v17 = vld [vmem:[#allocation9 + $0x2e0] ss:$16 sps:$4 sm:$0xff]  }
 0x1ab   :  { %2036 = vmatpush1.bf16.msra.mxu0 %v2831_v49  ;;  %2118 = vmatpush1.bf16.msra.mxu1 %v2834_v50  ;;  %v2888_v49 = vld [vmem:[#allocation9 + $0x2e8] ss:$16 sps:$4 sm:$0xff]   ;;  %v2893_v50 = vld [vmem:[#allocation9 + $0x304] ss:$16 sps:$4 sm:$0xff]  }
 0x1ac   :  { %2037 = vmatprep.subr.bf16.mxu0 %v2839_v51  ;;  %2119 = vmatprep.subr.bf16.mxu1 %v2842_v52  ;;  %v2896_v51 = vld [vmem:[#allocation9 + $0x30c] ss:$16 sps:$4 sm:$0xff]   ;;  %v2891_v52 = vld [vmem:[#allocation9 + $0x300] ss:$16 sps:$4 sm:$0xff]  }
 0x1af   :  { %2038 = vmatpush1.bf16.msra.mxu0 %v2837_v30  ;;  %2120 = vmatpush1.bf16.msra.mxu1 %v2840_v53  ;;  %v2894_v30 = vld [vmem:[#allocation9 + $0x308] ss:$16 sps:$4 sm:$0xff]   ;;  %v2899_v53 = vld [vmem:[#allocation9 + $0x324] ss:$16 sps:$4 sm:$0xff]  }
 0x1b0   :  { %2048 = vmatprep.subr.bf16.mxu0 %v2845_v54  ;;  %2130 = vmatprep.subr.bf16.mxu1 %v2848_v55  ;;  %v2902_v54 = vld [vmem:[#allocation9 + $0x32c] ss:$16 sps:$4 sm:$0xff]   ;;  %v2897_v55 = vld [vmem:[#allocation9 + $0x320] ss:$16 sps:$4 sm:$0xff]  }
 0x245   :  { %v1120_v60 = vpop.f32.mrb[4].mxu0  ;;  %v3217_v61 = vpop.f32.mrb[4].mxu1 }
 0x246   :  { %v2510_v62 = vadd.f32 %v1120_v60, %v388_v57  ;;  %v1122_v63 = vpop.f32.mrb[5].mxu0  ;;  %v1204_v0 = vpop.f32.mrb[5].mxu1  ;;  %v2900_v57 = vld [vmem:[#allocation9 + $0x328] ss:$16 sps:$4 sm:$0xff]   ;;  %v2903_v60 = vld [vmem:[#allocation9 + $0x340] ss:$16 sps:$4 sm:$0xff]  }
 0x247   :  { %v2511_v1 = vadd.f32 %v1122_v63, %v392_v58  ;;  %v2513_v2 = vadd.f32 %v1204_v0, %v400_v59  ;;  %v1124_v3 = vpop.f32.mrb[6].mxu0  ;;  %v1206_v4 = vpop.f32.mrb[6].mxu1  ;;  %v2905_v58 = vld [vmem:[#allocation9 + $0x344] ss:$16 sps:$4 sm:$0xff]   ;;  %v2908_v59 = vld [vmem:[#allocation9 + $0x34c] ss:$16 sps:$4 sm:$0xff]  }
 0x248   :  { %v1209_v5 = vmax.f32 %v2510_v62, 0.0  ;;  %v1125_v6 = vpop.f32.mrb[7].mxu0  ;;  %v1207_v7 = vpop.f32.mrb[7].mxu1  ;;  %v2906_v62 = vld [vmem:[#allocation9 + $0x348] ss:$16 sps:$4 sm:$0xff]  }
 0x249   :  { %v1210_v8 = vmax.f32 %v2511_v1, 0.0  ;;  %v1212_v9 = vmax.f32 %v2513_v2, 0.0  ;;  %v2911_v63 = vld [vmem:[#allocation9 + $0x364] ss:$16 sps:$4 sm:$0xff]   ;;  %v2914_v0 = vld [vmem:[#allocation9 + $0x36c] ss:$16 sps:$4 sm:$0xff]  }
 0x24a   :  { %v1213_v13 = vpack.c.bf16 %v1209_v5, %v1209_v5  ;;  %v2909_v1 = vld [vmem:[#allocation9 + $0x360] ss:$16 sps:$4 sm:$0xff]   ;;  %v2912_v2 = vld [vmem:[#allocation9 + $0x368] ss:$16 sps:$4 sm:$0xff]   ;;  %v2917_v3 = vld [vmem:[#allocation9 + $0x384] ss:$16 sps:$4 sm:$0xff]  }
 0x24b   :  { %v1214_v10 = vpack.c.bf16 %v1210_v8, %v1210_v8  ;;  %v1216_v22 = vpack.c.bf16 %v1212_v9, %v1212_v9  ;;  %v2920_v4 = vld [vmem:[#allocation9 + $0x38c] ss:$16 sps:$4 sm:$0xff]   ;;  %v2915_v5 = vld [vmem:[#allocation9 + $0x380] ss:$16 sps:$4 sm:$0xff]   ;;  %v2918_v6 = vld [vmem:[#allocation9 + $0x388] ss:$16 sps:$4 sm:$0xff]  }
 0x24c   :  { %v2923_v7 = vld [vmem:[#allocation9 + $0x3a4] ss:$16 sps:$4 sm:$0xff]   ;;  %v2926_v8 = vld [vmem:[#allocation9 + $0x3ac] ss:$16 sps:$4 sm:$0xff]   ;;  %v2921_v9 = vld [vmem:[#allocation9 + $0x3a0] ss:$16 sps:$4 sm:$0xff]  }
 0x24d   :  { %2039 = vmatprep.mubr.bf16.mxu0 %v1214_v10  ;;  %2121 = vmatprep.mubr.bf16.mxu1 %v1214_v10  ;;  %v2924_v10 = vld [vmem:[#allocation9 + $0x3a8] ss:$16 sps:$4 sm:$0xff]  }
 0x24e   :  { %2040 = vmatmul.mubr.bf16.vlgmr.msra.gmra.mrb[8].mxu0 %v1213_v13  ;;  %2122 = vmatmul.mubr.bf16.vlgmr.msra.gmra.mrb[8].mxu1 %v1213_v13  ;;  %v2932_v13 = vld [vmem:[#allocation9 + $0x3cc] ss:$16 sps:$4 sm:$0xff]  }
 0x24f   :  { %2049 = vmatpush1.bf16.msra.mxu0 %v2843_v11  ;;  %2131 = vmatpush1.bf16.msra.mxu1 %v2846_v12  ;;  %v396_v11 = vrot.slane %v3209_v56, %v3201_v33  ;;  %v2929_v12 = vld [vmem:[#allocation9 + $0x3c4] ss:$16 sps:$4 sm:$0xff]  }
 0x250   :  { %2080 = vmatprep.mubr.bf16.mxu0 %v1216_v22  ;;  %2162 = vmatprep.mubr.bf16.mxu1 %v1216_v22 }
 0x251   :  { %2050 = vmatprep.subr.bf16.mxu0 %v2851_v19  ;;  %2132 = vmatprep.subr.bf16.mxu1 %v2854_v21  ;;  %v2927_v19 = vld [vmem:[#allocation9 + $0x3c0] ss:$16 sps:$4 sm:$0xff]   ;;  %v2930_v21 = vld [vmem:[#allocation9 + $0x3c8] ss:$16 sps:$4 sm:$0xff]   ;;  %v2512_v22 = vadd.f32 %v3217_v61, %v396_v11 }
 0x252   :  { %v1345_v61 = vld [vmem:[%s3257_s6] sm:$0xf]  ;;  %s3064_s6 = smov [#allocation11]  }
 0x253   :  { %2051 = vmatpush1.bf16.msra.mxu0 %v2849_v23  ;;  %2133 = vmatpush1.bf16.msra.mxu1 %v2852_v24  ;;  %v2935_v23 = vld [vmem:[#allocation9 + $0x3e4] ss:$16 sps:$4 sm:$0xff]   ;;  %v2938_v24 = vld [vmem:[#allocation9 + $0x3ec] ss:$16 sps:$4 sm:$0xff]  }
 0x254   :  { %2052 = vmatprep.subr.bf16.mxu0 %v2857_v25  ;;  %2134 = vmatprep.subr.bf16.mxu1 %v2860_v26  ;;  %v2933_v25 = vld [vmem:[#allocation9 + $0x3e0] ss:$16 sps:$4 sm:$0xff]   ;;  %v2936_v26 = vld [vmem:[#allocation9 + $0x3e8] ss:$16 sps:$4 sm:$0xff]  }
 0x257   :  { %2053 = vmatpush1.bf16.msra.mxu0 %v2855_v27  ;;  %2135 = vmatpush1.bf16.msra.mxu1 %v2858_v28  ;;  %v1211_v27 = vmax.f32 %v2512_v22, 0.0  ;;  %v1350_v28 = vrot.slane %v1345_v61, %v3179_v16 }
 0x258   :  { %2054 = vmatprep.subr.bf16.mxu0 %v2863_v29  ;;  %2136 = vmatprep.subr.bf16.mxu1 %v2866_v31  ;;  %v1358_v29 = vrot.slane %v1345_v61, %v3201_v33  ;;  %v2175_v31 = vld [vmem:[%s3258_s7] sm:$0xf]  ;;  %s2233_s7 = sshll.u32 %s3064_s6, 4  ;;  %s2234_s7 = int_to_ptr.vmem [resolvable:$true] %s2233_s7 }
 0x259   :  { %v1215_v56 = vpack.c.bf16 %v1211_v27, %v1211_v27  ;;  %s3027_s18 = scalar_lea.vmem %s2234_s7, 16  ;;  %s3031_s19 = scalar_lea.vmem %s2234_s7, 32 }
 0x25a   :  { %p3028_p4 = scmp.ne.s32.totalorder %s2234_s7, %s3027_s18  ;;  %p3032_p5 = scmp.lt.s32.totalorder %s2234_s7, %s2234_s7 }
 0x25b   :  { %2055 = vmatpush1.bf16.msra.mxu0 %v2861_v32  ;;  %2137 = vmatpush1.bf16.msra.mxu1 %v2864_v34  ;;  %v1354_v32 = vrot.slane %v1345_v61, %v3187_v18  ;;  %v1362_v34 = vrot.slane %v1345_v61, %v3192_v20  ;;  %p3033_p6 = scmp.lt.s32.totalorder %s3031_s19, %s3027_s18 }
 0x25c   :  { %2056 = vmatprep.subr.bf16.mxu0 %v2869_v35  ;;  %2138 = vmatprep.subr.bf16.mxu1 %v2872_v36 }
 0x25d   :  { %p3034_p7 = por %p3033_p6, %p3032_p5 }
 0x25f   :  { %2057 = vmatpush1.bf16.msra.mxu0 %v2867_v37  ;;  %2139 = vmatpush1.bf16.msra.mxu1 %v2870_v38  ;;  %v2180_v38 = vrot.slane %v2175_v31, %v3179_v16  ;;  %p3035_p8 = pnand %p3034_p7, %p3028_p4 }
 0x260   :  { %2058 = vmatprep.subr.bf16.mxu0 %v2875_v39  ;;  %2140 = vmatprep.subr.bf16.mxu1 %v2878_v40 }
 0x263   :  { %2059 = vmatpush1.bf16.msra.mxu0 %v2873_v41  ;;  %2141 = vmatpush1.bf16.msra.mxu1 %v2876_v42 }
 0x264   :  { %2060 = vmatprep.subr.bf16.mxu0 %v2881_v43  ;;  %2142 = vmatprep.subr.bf16.mxu1 %v2884_v44  ;;  %v2184_v43 = vrot.slane %v2175_v31, %v3187_v18 }
 0x267   :  { %2061 = vmatpush1.bf16.msra.mxu0 %v2879_v45  ;;  %2143 = vmatpush1.bf16.msra.mxu1 %v2882_v46 }
 0x268   :  { %2062 = vmatprep.subr.bf16.mxu0 %v2887_v47  ;;  %2144 = vmatprep.subr.bf16.mxu1 %v2890_v48 }
 0x26b   :  { %2063 = vmatpush1.bf16.msra.mxu0 %v2885_v17  ;;  %2145 = vmatpush1.bf16.msra.mxu1 %v2888_v49 }
 0x26c   :  { %2064 = vmatprep.subr.bf16.mxu0 %v2893_v50  ;;  %2146 = vmatprep.subr.bf16.mxu1 %v2896_v51  ;;  %v2188_v50 = vrot.slane %v2175_v31, %v3201_v33 }
 0x26f   :  { %2065 = vmatpush1.bf16.msra.mxu0 %v2891_v52  ;;  %2147 = vmatpush1.bf16.msra.mxu1 %v2894_v30 }
 0x270   :  { %2066 = vmatprep.subr.bf16.mxu0 %v2899_v53  ;;  %2148 = vmatprep.subr.bf16.mxu1 %v2902_v54  ;;  %v2192_v54 = vrot.slane %v2175_v31, %v3192_v20 }
 0x273   :  { %2067 = vmatpush1.bf16.msra.mxu0 %v2897_v55  ;;  %2149 = vmatpush1.bf16.msra.mxu1 %v2900_v57 }
 0x274   :  { %2068 = vmatprep.subr.bf16.mxu0 %v2905_v58  ;;  %2150 = vmatprep.subr.bf16.mxu1 %v2908_v59 }
 0x277   :  { %2069 = vmatpush1.bf16.msra.mxu0 %v2903_v60  ;;  %2151 = vmatpush1.bf16.msra.mxu1 %v2906_v62  ;;  %v2206_v60 = vld [vmem:[#allocation2] sm:$0x1] }
 0x278   :  { %2070 = vmatprep.subr.bf16.mxu0 %v2911_v63  ;;  %2152 = vmatprep.subr.bf16.mxu1 %v2914_v0  ;;  %v2219_v63 = vand.u32 127, %v101_v14 }
 0x27a   :  { %v2222_v33 = vsub.s32 %v2219_v63, %v3176_v15 }
 0x27b   :  { %2071 = vmatpush1.bf16.msra.mxu0 %v2909_v1  ;;  %2153 = vmatpush1.bf16.msra.mxu1 %v2912_v2 }
 0x27c   :  { %2072 = vmatprep.subr.bf16.mxu0 %v2917_v3  ;;  %2154 = vmatprep.subr.bf16.mxu1 %v2920_v4 }
 0x27f   :  { %2073 = vmatpush1.bf16.msra.mxu0 %v2915_v5  ;;  %2155 = vmatpush1.bf16.msra.mxu1 %v2918_v6 }
 0x280   :  { %2074 = vmatprep.subr.bf16.mxu0 %v2923_v7  ;;  %2156 = vmatprep.subr.bf16.mxu1 %v2926_v8 }
 0x283   :  { %2075 = vmatpush1.bf16.msra.mxu0 %v2921_v9  ;;  %2157 = vmatpush1.bf16.msra.mxu1 %v2924_v10 }
 0x284   :  { %2076 = vmatprep.subr.bf16.mxu0 %v2929_v12  ;;  %2158 = vmatprep.subr.bf16.mxu1 %v2932_v13 }
 0x287   :  { %2077 = vmatpush1.bf16.msra.mxu0 %v2927_v19  ;;  %2159 = vmatpush1.bf16.msra.mxu1 %v2930_v21 }
 0x288   :  { %2078 = vmatprep.subr.bf16.mxu0 %v2935_v23  ;;  %2160 = vmatprep.subr.bf16.mxu1 %v2938_v24 }
 0x28b   :  { %2079 = vmatpush1.bf16.msra.mxu0 %v2933_v25  ;;  %2161 = vmatpush1.bf16.msra.mxu1 %v2936_v26 }
 0x28e   :  { %2081 = vmatmul.mubr.bf16.vlgmr.msra.gmra.mrb[8].mxu0 %v1215_v56  ;;  %2163 = vmatmul.mubr.bf16.vlgmr.msra.gmra.mrb[8].mxu1 %v1215_v56 }
 0x361   :  { %v2082_v35 = vpop.f32.mrb[8].mxu0  ;;  %v2164_v36 = vpop.f32.mrb[8].mxu1 }
 0x362   :  { %v2514_v37 = vadd.f32 %v2082_v35, %v1350_v28  ;;  %v2516_v39 = vadd.f32 %v2164_v36, %v1358_v29  ;;  %v2084_v40 = vpop.f32.mrb[9].mxu0  ;;  %v2166_v41 = vpop.f32.mrb[9].mxu1 }
 0x363   :  { %v2515_v42 = vadd.f32 %v2084_v40, %v1354_v32  ;;  %v2517_v44 = vadd.f32 %v2166_v41, %v1362_v34  ;;  %v2086_v45 = vpop.f32.mrb[10].mxu0  ;;  %v2168_v46 = vpop.f32.mrb[10].mxu1 }
 0x364   :  { %v2171_v47 = vmax.f32 %v2514_v37, 0.0  ;;  %v2087_v48 = vpop.f32.mrb[11].mxu0  ;;  %v2169_v17 = vpop.f32.mrb[11].mxu1  ;;  %v2173_v49 = vmax.f32 %v2516_v39, 0.0 }
 0x365   :  { %v2172_v51 = vmax.f32 %v2515_v42, 0.0  ;;  %v2174_v53 = vmax.f32 %v2517_v44, 0.0 }
 0x366   :  { %v2197_v52 = vmul.f32 %v2180_v38, %v2171_v47  ;;  %v2199_v55 = vmul.f32 %v2188_v50, %v2173_v49 }
 0x367   :  { %v2198_v30 = vmul.f32 %v2184_v43, %v2172_v51  ;;  %v2200_v58 = vmul.f32 %v2192_v54, %v2174_v53 }
 0x369   :  { %v2201_v57 = vadd.f32 %v2198_v30, %v2197_v52 }
 0x36b   :  { %v2202_v59 = vadd.f32 %v2201_v57, %v2199_v55 }
 0x36d   :  { %v2203_v18 = vadd.f32 %v2202_v59, %v2200_v58 }
 0x36f   :  { %2204 = vadd.xlane.f32.xlu0 %v2203_v18 }
 0x385   :  { %2209 = vperm.xlu0 %2542, %v2206_v60  }
 0x3fc   :  { %v2205_v62 = vpop.xlane.xlu0 %2204 }
 0x404   :  { %v2210_v0 = vpop.permute.xlu0 %2209 }
 0x405   :  { %v2215_v1 = vrot.slane %v2210_v0, %v3179_v16 }
 0x407   :  { %v2216_v2 = vadd.f32 %v2215_v1, %v2205_v62 }
 0x409   :  { %v2223_v20 = vrot.slane %v2216_v2, %v2222_v33 }
 0x40b   :  { %2226 = vst.msk [vmem:[#allocation11] sm:$0x1] %vm2225_vm1, %v2223_v20 }
 0x40c   :  { %3038 = shalt.err (!%p3035_p8)
}
 0x40d   :  { %s3039_s23 = scalar_lea.hbm %s3260_s9, 16 }
 0x40e   :  { %p3040_p9 = scmp.ne.s32.totalorder %s3260_s9, %s3039_s23  ;;  %p3043_p10 = scmp.lt.u32.totalorder %s3039_s23, %s3260_s9 }
 0x410   :  { %p3045_p11 = pnand %p3043_p10, %p3040_p9 }
 0x412   :  { %3048 = shalt.err (!%p3045_p11)
}
 0x413   :  { %2236 = dma.vmem_to_hbm [thread:$0]  %s2234_s7, 16, %s3260_s9, [#allocation5]  }
 0x414   :  { %3055 = dma.done.wait [#allocation5], 16  }
 0x415   :  { %3056 = vsyncadd [#allocation5], 4294967280 }
 0x416   :  { %2240 = vsyncpa [#allocation4], 1 }
 0x417   :  { %2241 = vsyncpa [#allocation7], 1 }
 0x418   :  { %2242 = vsyncpa [#allocation10], 1 }
 0x419   :  { %2243 = vsyncpa [#allocation5], 1 }

</bundles_post_ra>
